<compile_context>
chip_gen: v7x
topology: tpu7x:2x2x1
jax: 0.10.0
libtpu: 0.0.40
codegen_flags: <defaults>
</compile_context>

<pallas_src>
import functools

import jax
import jax.numpy as jnp
from jax import lax
from jax.experimental import pallas as pl
from jax.experimental.pallas import tpu as pltpu


def _round_up(x, m):
    return -(-x // m) * m


def _convsnp_kernel(scale_ref, x_ref, w_ref, b_ref, o_ref, xscr, taps, *,
                    H, W, K, Cin, G, Nb, pad, interior, scratch_len,
                    kkc, kkc_pad):
    # scale_ref : (1, 1)                 f32  SMEM  precomputed 1/(1 - lambda)
    # x_ref     : (Nb, Cin, H*W)         f32  VMEM  unpadded, spatial flattened
    # w_ref     : (G, kkc_pad)           bf16 VMEM  pre-flattened conv weight
    # b_ref     : (G, 1)                 f32  VMEM
    # o_ref     : (Nb, G, H*W)           f32  VMEM  lane-dense NCHW-flat output
    # xscr      : (Cin, scratch_len)     bf16 VMEM  flat, zero-bordered image
    # taps      : (kkc_pad, Nb*H*W)      bf16 VMEM  im2col stack (matmul RHS)
    HW = H * W
    left = interior - pad * W

    # Zero only the small border strips (the interior is fully rewritten every
    # image).  Done unconditionally: scratch is per-core and a core may never
    # see program_id 0 when the grid is split across TensorCores.
    if interior > 0:
        xscr[:, pl.ds(0, interior)] = jnp.zeros((Cin, interior), jnp.bfloat16)
    tail = scratch_len - (interior + HW)
    if tail > 0:
        xscr[:, pl.ds(interior + HW, tail)] = jnp.zeros((Cin, tail),
                                                        jnp.bfloat16)
    # Zero the contraction-padding rows of the im2col stack (their weight
    # columns are zero, but keep the operand fully defined).
    if kkc_pad > kkc:
        taps[pl.ds(kkc, kkc_pad - kkc), :] = jnp.zeros(
            (kkc_pad - kkc, Nb * HW), jnp.bfloat16)

    # Column-validity masks (one per kw), built in-kernel and hoisted out of
    # the tap loop.  (On v5e the bf16 elementwise math is promoted to f32 by
    # the compiler; correctness is unaffected.)
    col = lax.broadcasted_iota(jnp.int32, (1, HW), 1) % W
    masks = [jnp.logical_and(col + (kw - pad) >= 0,
                             col + (kw - pad) < W).astype(jnp.bfloat16)
             for kw in range(K)]

    # im2col: every tap is a static lane-offset slice of the flat image; the
    # zero border realizes vertical padding, the per-kw mask kills horizontal
    # (row-wraparound) columns.
    for b in range(Nb):
        # ReLU + f32->bf16 cast, written once at a 128-lane-aligned offset.
        xscr[:, pl.ds(interior, HW)] = jnp.maximum(
            x_ref[b], 0.0).astype(jnp.bfloat16)
        for kh in range(K):
            for kw in range(K):
                t = kh * K + kw
                start = left + kh * W + kw - pad          # static lane offset
                patch = xscr[:, pl.ds(start, HW)]         # (Cin, HW) bf16
                taps[pl.ds(t * Cin, Cin),
                     pl.ds(b * HW, HW)] = patch * masks[kw]

    # One deep MXU matmul for the whole conv (all taps, all Nb images).
    acc = jnp.dot(w_ref[...], taps[...],
                  preferred_element_type=jnp.float32)      # (G, Nb*HW) f32
    acc = (acc + b_ref[...]) * scale_ref[0, 0]

    for b in range(Nb):
        o_ref[b] = acc[:, b * HW:(b + 1) * HW].astype(o_ref.dtype)


def conv_snp(x_nchw, weight_oihw, bias, lamda, *, kSize=5, dilation=1,
             images_per_step=None):
    """ConvSNP forward (use=True branch).  x_nchw: (N, Cin, H, W) float32."""
    assert dilation == 1, "only dilation=1 implemented"
    N, Cin, H, W = x_nchw.shape
    G = weight_oihw.shape[0]
    K = kSize
    pad = (K - 1) // 2 * dilation
    HW = H * W
    KKC = K * K * Cin
    KKC_pad = _round_up(KKC, 16)          # bf16 sublane tile

    # Images per grid step (fold batch into the matmul RHS); keep grid >= 2 so
    # both v7x TensorCores still get work.
    if images_per_step is None:
        images_per_step = 1
        if N >= 4:
            for nb in (4, 2):
                if N % nb == 0:
                    images_per_step = nb
                    break
    Nb = images_per_step
    assert N % Nb == 0, "images_per_step must divide the batch"

    # Flat-scratch geometry (all static).  The ReLU'd image sits at a
    # 128-lane-aligned offset inside a zero border that realizes the vertical
    # padding; tap (kh, kw) is the slice [interior - pad*W + kh*W + kw - pad, +HW).
    interior = _round_up(pad * W + pad, 128)
    scratch_len = _round_up(interior + HW + pad * W + pad, 128)

    # Layout-free glue: flatten spatial, pre-flatten the tiny weight to the
    # im2col contraction order (kh, kw, cin), zero-pad to KKC_pad, cast bf16;
    # precompute the scalar 1/(1 - lambda).
    x_flat = x_nchw.reshape(N, Cin, HW)
    w_flat = jnp.transpose(weight_oihw, (0, 2, 3, 1)).reshape(G, KKC)
    w_flat = jnp.pad(w_flat, ((0, 0), (0, KKC_pad - KKC))).astype(jnp.bfloat16)
    b_col = bias.astype(jnp.float32).reshape(G, 1)
    scale = (1.0 / (1.0 - jnp.asarray(lamda, jnp.float32))).reshape(1, 1)

    kernel = functools.partial(
        _convsnp_kernel, H=H, W=W, K=K, Cin=Cin, G=G, Nb=Nb, pad=pad,
        interior=interior, scratch_len=scratch_len, kkc=KKC, kkc_pad=KKC_pad)

    # Explicit VMEM budget (double-buffered blocks + scratch) so the same
    # whole-image blocking also compiles against v7x's 64 MiB VMEM.
    est = (2 * Nb * Cin * HW * 4          # image blocks
           + 2 * G * KKC_pad * 2          # weight
           + 2 * G * 4                    # bias
           + 2 * Nb * G * HW * 4          # output blocks
           + Cin * scratch_len * 2        # xscr
           + KKC_pad * Nb * HW * 2)       # taps
    vmem_limit = int(min(64 << 20, max(32 << 20, 2 * est)))

    out_flat = pl.pallas_call(
        kernel,
        out_shape=jax.ShapeDtypeStruct((N, G, HW), jnp.float32),
        grid_spec=pltpu.PrefetchScalarGridSpec(
            num_scalar_prefetch=0,
            grid=(N // Nb,),
            in_specs=[
                pl.BlockSpec(memory_space=pltpu.MemorySpace.SMEM),    # scale
                pl.BlockSpec((Nb, Cin, HW), lambda n: (n, 0, 0)),     # images
                pl.BlockSpec((G, KKC_pad), lambda n: (0, 0)),         # weight
                pl.BlockSpec((G, 1), lambda n: (0, 0)),               # bias
            ],
            out_specs=pl.BlockSpec((Nb, G, HW), lambda n: (n, 0, 0)),
            scratch_shapes=[
                pltpu.VMEM((Cin, scratch_len), jnp.bfloat16),         # xscr
                pltpu.VMEM((KKC_pad, Nb * HW), jnp.bfloat16),         # taps
            ],
        ),
        compiler_params=pltpu.CompilerParams(
            dimension_semantics=("parallel",),
            vmem_limit_bytes=vmem_limit,
        ),
    )(scale, x_flat, w_flat, b_col)

    # Free reshape back to NCHW (output already channel-major, lane-dense).
    return out_flat.reshape(N, G, H, W)


def conv_snp_reference(x_nchw, weight_oihw, bias, lamda, *, kSize=5):
    """Pure-JAX f32 reference (mirrors the PyTorch forward) for validation."""
    pad = (kSize - 1) // 2
    x = jnp.maximum(x_nchw, 0.0)
    out = lax.conv_general_dilated(
        x, weight_oihw,
        window_strides=(1, 1),
        padding=((pad, pad), (pad, pad)),
        dimension_numbers=("NCHW", "OIHW", "NCHW"),
    )
    out = out + bias.reshape(1, -1, 1, 1)
    return out / (1.0 - lamda)


if __name__ == "__main__":
    # Small shapes consistent with the module: inChannels=4, growRate=8, kSize=5.
    N, Cin, H, W = 2, 4, 16, 16
    G, K = 8, 5

    key = jax.random.PRNGKey(0)
    kx, kwt, kb = jax.random.split(key, 3)

    x = jax.random.normal(kx, (N, Cin, H, W), dtype=jnp.float32)
    weight = 0.1 * jax.random.normal(kwt, (G, Cin, K, K), dtype=jnp.float32)
    bias = 0.1 * jax.random.normal(kb, (G,), dtype=jnp.float32)
    lamda = jnp.float32(0.001)  # nn.Parameter(torch.tensor(0.001))

    out = conv_snp(x, weight, bias, lamda, kSize=K)
    out = jax.block_until_ready(out)

    ref = conv_snp_reference(x, weight, bias, lamda, kSize=K)
    assert out.shape == (N, G, H, W)
    # bf16 MXU inputs with f32 accumulation -> slightly looser tolerance.
    assert jnp.allclose(out, ref, atol=2e-2, rtol=2e-2), float(
        jnp.max(jnp.abs(out - ref)))

    print("KERNEL_OK")
</pallas_src>

<mosaic_0001>
module attributes {stable_mosaic.version = 11 : i64} {
  func.func @_convsnp_kernel(%arg0: i32, %arg1: memref<1x1xf32, #tpu.memory_space<smem>>, %arg2: memref<1x4x256xf32, #tpu.memory_space<vmem>>, %arg3: memref<8x112xbf16, #tpu.memory_space<vmem>>, %arg4: memref<8x1xf32, #tpu.memory_space<vmem>>, %arg5: memref<1x8x256xf32, #tpu.memory_space<vmem>>, %arg6: memref<4x512xbf16, #tpu.memory_space<vmem>>, %arg7: memref<112x256xbf16, #tpu.memory_space<vmem>>) attributes {dimension_semantics = [#tpu.dimension_semantics<parallel>], iteration_bounds = array<i64: 2>, scalar_prefetch = 0 : i64, scratch_operands = 2 : i64, tpu.core_type = #tpu.core_type<tc>, window_params = [{transform_indices = @transform_0, window_bounds = array<i64: 1, 1>}, {transform_indices = @transform_1, window_bounds = array<i64: 1, 4, 256>}, {pipeline_mode = #tpu.pipeline_mode<synchronous>, transform_indices = @transform_2, window_bounds = array<i64: 8, 112>}, {pipeline_mode = #tpu.pipeline_mode<synchronous>, transform_indices = @transform_3, window_bounds = array<i64: 8, 1>}, {transform_indices = @transform_4, window_bounds = array<i64: 1, 8, 256>}]} {
    %cst = arith.constant 0.000000e+00 : bf16
    %0 = vector.broadcast %cst : bf16 to vector<4x128xbf16>
    %c0 = arith.constant 0 : index
    %c0_0 = arith.constant 0 : index
    %1 = vector.load %arg6[%c0, %c0_0] : memref<4x512xbf16, #tpu.memory_space<vmem>>, vector<4x128xbf16>
    tpu.vector_store %arg6[%c0, %c0_0], %0 {strides = array<i32>} : memref<4x512xbf16, #tpu.memory_space<vmem>>, vector<4x128xbf16>,
    %cst_1 = arith.constant 0.000000e+00 : bf16
    %2 = vector.broadcast %cst_1 : bf16 to vector<4x128xbf16>
    %c0_2 = arith.constant 0 : index
    %c384 = arith.constant 384 : index
    %3 = vector.load %arg6[%c0_2, %c384] : memref<4x512xbf16, #tpu.memory_space<vmem>>, vector<4x128xbf16>
    tpu.vector_store %arg6[%c0_2, %c384], %2 {strides = array<i32>} : memref<4x512xbf16, #tpu.memory_space<vmem>>, vector<4x128xbf16>,
    %cst_3 = arith.constant 0.000000e+00 : bf16
    %4 = vector.broadcast %cst_3 : bf16 to vector<12x256xbf16>
    %c100 = arith.constant 100 : index
    %c0_4 = arith.constant 0 : index
    %5 = vector.load %arg7[%c100, %c0_4] : memref<112x256xbf16, #tpu.memory_space<vmem>>, vector<12x256xbf16>
    tpu.vector_store %arg7[%c100, %c0_4], %4 {strides = array<i32>} : memref<112x256xbf16, #tpu.memory_space<vmem>>, vector<12x256xbf16>,
    %6 = tpu.iota {dimensions = array<i32: 1>} : vector<1x256xi32>
    %c16_i32 = arith.constant 16 : i32
    %c0_i32 = arith.constant 0 : i32
    %7 = arith.cmpi eq, %c16_i32, %c0_i32 : i32
    %c1_i32 = arith.constant 1 : i32
    %8 = arith.select %7, %c1_i32, %c16_i32 : i32
    %9 = vector.broadcast %8 : i32 to vector<1x256xi32>
    %10 = arith.remsi %6, %9 : vector<1x256xi32>
    %c0_i32_5 = arith.constant 0 : i32
    %11 = vector.broadcast %c0_i32_5 : i32 to vector<1x256xi32>
    %12 = arith.cmpi ne, %10, %11 : vector<1x256xi32>
    %c0_i32_6 = arith.constant 0 : i32
    %13 = vector.broadcast %c0_i32_6 : i32 to vector<1x256xi32>
    %14 = arith.cmpi slt, %10, %13 : vector<1x256xi32>
    %c0_i32_7 = arith.constant 0 : i32
    %15 = arith.cmpi slt, %8, %c0_i32_7 : i32
    %16 = vector.broadcast %15 : i1 to vector<1x256xi1>
    %17 = vector.broadcast %16 : vector<1x256xi1> to vector<1x256xi1>
    %18 = arith.xori %14, %17 : vector<1x256xi1>
    %19 = arith.andi %18, %12 : vector<1x256xi1>
    %20 = vector.broadcast %8 : i32 to vector<1x256xi32>
    %21 = arith.addi %10, %20 : vector<1x256xi32>
    %22 = arith.select %19, %21, %10 : vector<1x256xi1>, vector<1x256xi32>
    %c-2_i32 = arith.constant -2 : i32
    %23 = vector.broadcast %c-2_i32 : i32 to vector<1x256xi32>
    %24 = arith.addi %22, %23 : vector<1x256xi32>
    %c0_i32_8 = arith.constant 0 : i32
    %25 = vector.broadcast %c0_i32_8 : i32 to vector<1x256xi32>
    %26 = arith.cmpi sge, %24, %25 : vector<1x256xi32>
    %c-2_i32_9 = arith.constant -2 : i32
    %27 = vector.broadcast %c-2_i32_9 : i32 to vector<1x256xi32>
    %28 = arith.addi %22, %27 : vector<1x256xi32>
    %c16_i32_10 = arith.constant 16 : i32
    %29 = vector.broadcast %c16_i32_10 : i32 to vector<1x256xi32>
    %30 = arith.cmpi slt, %28, %29 : vector<1x256xi32>
    %31 = arith.andi %26, %30 : vector<1x256xi1>
    %32 = arith.extui %31 : vector<1x256xi1> to vector<1x256xi32>
    %33 = arith.sitofp %32 : vector<1x256xi32> to vector<1x256xf32>
    %34 = arith.truncf %33 : vector<1x256xf32> to vector<1x256xbf16>
    %c-1_i32 = arith.constant -1 : i32
    %35 = vector.broadcast %c-1_i32 : i32 to vector<1x256xi32>
    %36 = arith.addi %22, %35 : vector<1x256xi32>
    %c0_i32_11 = arith.constant 0 : i32
    %37 = vector.broadcast %c0_i32_11 : i32 to vector<1x256xi32>
    %38 = arith.cmpi sge, %36, %37 : vector<1x256xi32>
    %c-1_i32_12 = arith.constant -1 : i32
    %39 = vector.broadcast %c-1_i32_12 : i32 to vector<1x256xi32>
    %40 = arith.addi %22, %39 : vector<1x256xi32>
    %c16_i32_13 = arith.constant 16 : i32
    %41 = vector.broadcast %c16_i32_13 : i32 to vector<1x256xi32>
    %42 = arith.cmpi slt, %40, %41 : vector<1x256xi32>
    %43 = arith.andi %38, %42 : vector<1x256xi1>
    %44 = arith.extui %43 : vector<1x256xi1> to vector<1x256xi32>
    %45 = arith.sitofp %44 : vector<1x256xi32> to vector<1x256xf32>
    %46 = arith.truncf %45 : vector<1x256xf32> to vector<1x256xbf16>
    %c0_i32_14 = arith.constant 0 : i32
    %47 = vector.broadcast %c0_i32_14 : i32 to vector<1x256xi32>
    %48 = arith.addi %22, %47 : vector<1x256xi32>
    %c0_i32_15 = arith.constant 0 : i32
    %49 = vector.broadcast %c0_i32_15 : i32 to vector<1x256xi32>
    %50 = arith.cmpi sge, %48, %49 : vector<1x256xi32>
    %c0_i32_16 = arith.constant 0 : i32
    %51 = vector.broadcast %c0_i32_16 : i32 to vector<1x256xi32>
    %52 = arith.addi %22, %51 : vector<1x256xi32>
    %c16_i32_17 = arith.constant 16 : i32
    %53 = vector.broadcast %c16_i32_17 : i32 to vector<1x256xi32>
    %54 = arith.cmpi slt, %52, %53 : vector<1x256xi32>
    %55 = arith.andi %50, %54 : vector<1x256xi1>
    %56 = arith.extui %55 : vector<1x256xi1> to vector<1x256xi32>
    %57 = arith.sitofp %56 : vector<1x256xi32> to vector<1x256xf32>
    %58 = arith.truncf %57 : vector<1x256xf32> to vector<1x256xbf16>
    %c1_i32_18 = arith.constant 1 : i32
    %59 = vector.broadcast %c1_i32_18 : i32 to vector<1x256xi32>
    %60 = arith.addi %22, %59 : vector<1x256xi32>
    %c0_i32_19 = arith.constant 0 : i32
    %61 = vector.broadcast %c0_i32_19 : i32 to vector<1x256xi32>
    %62 = arith.cmpi sge, %60, %61 : vector<1x256xi32>
    %c1_i32_20 = arith.constant 1 : i32
    %63 = vector.broadcast %c1_i32_20 : i32 to vector<1x256xi32>
    %64 = arith.addi %22, %63 : vector<1x256xi32>
    %c16_i32_21 = arith.constant 16 : i32
    %65 = vector.broadcast %c16_i32_21 : i32 to vector<1x256xi32>
    %66 = arith.cmpi slt, %64, %65 : vector<1x256xi32>
    %67 = arith.andi %62, %66 : vector<1x256xi1>
    %68 = arith.extui %67 : vector<1x256xi1> to vector<1x256xi32>
    %69 = arith.sitofp %68 : vector<1x256xi32> to vector<1x256xf32>
    %70 = arith.truncf %69 : vector<1x256xf32> to vector<1x256xbf16>
    %c2_i32 = arith.constant 2 : i32
    %71 = vector.broadcast %c2_i32 : i32 to vector<1x256xi32>
    %72 = arith.addi %22, %71 : vector<1x256xi32>
    %c0_i32_22 = arith.constant 0 : i32
    %73 = vector.broadcast %c0_i32_22 : i32 to vector<1x256xi32>
    %74 = arith.cmpi sge, %72, %73 : vector<1x256xi32>
    %c2_i32_23 = arith.constant 2 : i32
    %75 = vector.broadcast %c2_i32_23 : i32 to vector<1x256xi32>
    %76 = arith.addi %22, %75 : vector<1x256xi32>
    %c16_i32_24 = arith.constant 16 : i32
    %77 = vector.broadcast %c16_i32_24 : i32 to vector<1x256xi32>
    %78 = arith.cmpi slt, %76, %77 : vector<1x256xi32>
    %79 = arith.andi %74, %78 : vector<1x256xi1>
    %80 = arith.extui %79 : vector<1x256xi1> to vector<1x256xi32>
    %81 = arith.sitofp %80 : vector<1x256xi32> to vector<1x256xf32>
    %82 = arith.truncf %81 : vector<1x256xf32> to vector<1x256xbf16>
    %c0_25 = arith.constant 0 : index
    %c0_26 = arith.constant 0 : index
    %c0_27 = arith.constant 0 : index
    %83 = vector.load %arg2[%c0_25, %c0_26, %c0_27] : memref<1x4x256xf32, #tpu.memory_space<vmem>>, vector<1x4x256xf32>
    %84 = vector.shape_cast %83 : vector<1x4x256xf32> to vector<4x256xf32>
    %cst_28 = arith.constant 0.000000e+00 : f32
    %85 = vector.broadcast %cst_28 : f32 to vector<4x256xf32>
    %86 = arith.maximumf %84, %85 : vector<4x256xf32>
    %87 = arith.truncf %86 : vector<4x256xf32> to vector<4x256xbf16>
    %c0_29 = arith.constant 0 : index
    %c128 = arith.constant 128 : index
    %88 = vector.load %arg6[%c0_29, %c128] : memref<4x512xbf16, #tpu.memory_space<vmem>>, vector<4x256xbf16>
    tpu.vector_store %arg6[%c0_29, %c128], %87 {strides = array<i32>} : memref<4x512xbf16, #tpu.memory_space<vmem>>, vector<4x256xbf16>,
    %c0_30 = arith.constant 0 : index
    %c94 = arith.constant 94 : index
    %89 = vector.load %arg6[%c0_30, %c94] : memref<4x512xbf16, #tpu.memory_space<vmem>>, vector<4x256xbf16>
    %90 = vector.broadcast %34 : vector<1x256xbf16> to vector<4x256xbf16>
    %91 = arith.mulf %89, %90 : vector<4x256xbf16>
    %c0_31 = arith.constant 0 : index
    %c0_32 = arith.constant 0 : index
    %92 = vector.load %arg7[%c0_31, %c0_32] : memref<112x256xbf16, #tpu.memory_space<vmem>>, vector<4x256xbf16>
    tpu.vector_store %arg7[%c0_31, %c0_32], %91 {strides = array<i32>} : memref<112x256xbf16, #tpu.memory_space<vmem>>, vector<4x256xbf16>,
    %c0_33 = arith.constant 0 : index
    %c95 = arith.constant 95 : index
    %93 = vector.load %arg6[%c0_33, %c95] : memref<4x512xbf16, #tpu.memory_space<vmem>>, vector<4x256xbf16>
    %94 = vector.broadcast %46 : vector<1x256xbf16> to vector<4x256xbf16>
    %95 = arith.mulf %93, %94 : vector<4x256xbf16>
    %c4 = arith.constant 4 : index
    %c0_34 = arith.constant 0 : index
    %96 = vector.load %arg7[%c4, %c0_34] : memref<112x256xbf16, #tpu.memory_space<vmem>>, vector<4x256xbf16>
    tpu.vector_store %arg7[%c4, %c0_34], %95 {strides = array<i32>} : memref<112x256xbf16, #tpu.memory_space<vmem>>, vector<4x256xbf16>,
    %c0_35 = arith.constant 0 : index
    %c96 = arith.constant 96 : index
    %97 = vector.load %arg6[%c0_35, %c96] : memref<4x512xbf16, #tpu.memory_space<vmem>>, vector<4x256xbf16>
    %98 = vector.broadcast %58 : vector<1x256xbf16> to vector<4x256xbf16>
    %99 = arith.mulf %97, %98 : vector<4x256xbf16>
    %c8 = arith.constant 8 : index
    %c0_36 = arith.constant 0 : index
    %100 = vector.load %arg7[%c8, %c0_36] : memref<112x256xbf16, #tpu.memory_space<vmem>>, vector<4x256xbf16>
    tpu.vector_store %arg7[%c8, %c0_36], %99 {strides = array<i32>} : memref<112x256xbf16, #tpu.memory_space<vmem>>, vector<4x256xbf16>,
    %c0_37 = arith.constant 0 : index
    %c97 = arith.constant 97 : index
    %101 = vector.load %arg6[%c0_37, %c97] : memref<4x512xbf16, #tpu.memory_space<vmem>>, vector<4x256xbf16>
    %102 = vector.broadcast %70 : vector<1x256xbf16> to vector<4x256xbf16>
    %103 = arith.mulf %101, %102 : vector<4x256xbf16>
    %c12 = arith.constant 12 : index
    %c0_38 = arith.constant 0 : index
    %104 = vector.load %arg7[%c12, %c0_38] : memref<112x256xbf16, #tpu.memory_space<vmem>>, vector<4x256xbf16>
    tpu.vector_store %arg7[%c12, %c0_38], %103 {strides = array<i32>} : memref<112x256xbf16, #tpu.memory_space<vmem>>, vector<4x256xbf16>,
    %c0_39 = arith.constant 0 : index
    %c98 = arith.constant 98 : index
    %105 = vector.load %arg6[%c0_39, %c98] : memref<4x512xbf16, #tpu.memory_space<vmem>>, vector<4x256xbf16>
    %106 = vector.broadcast %82 : vector<1x256xbf16> to vector<4x256xbf16>
    %107 = arith.mulf %105, %106 : vector<4x256xbf16>
    %c16 = arith.constant 16 : index
    %c0_40 = arith.constant 0 : index
    %108 = vector.load %arg7[%c16, %c0_40] : memref<112x256xbf16, #tpu.memory_space<vmem>>, vector<4x256xbf16>
    tpu.vector_store %arg7[%c16, %c0_40], %107 {strides = array<i32>} : memref<112x256xbf16, #tpu.memory_space<vmem>>, vector<4x256xbf16>,
    %c0_41 = arith.constant 0 : index
    %c110 = arith.constant 110 : index
    %109 = vector.load %arg6[%c0_41, %c110] : memref<4x512xbf16, #tpu.memory_space<vmem>>, vector<4x256xbf16>
    %110 = vector.broadcast %34 : vector<1x256xbf16> to vector<4x256xbf16>
    %111 = arith.mulf %109, %110 : vector<4x256xbf16>
    %c20 = arith.constant 20 : index
    %c0_42 = arith.constant 0 : index
    %112 = vector.load %arg7[%c20, %c0_42] : memref<112x256xbf16, #tpu.memory_space<vmem>>, vector<4x256xbf16>
    tpu.vector_store %arg7[%c20, %c0_42], %111 {strides = array<i32>} : memref<112x256xbf16, #tpu.memory_space<vmem>>, vector<4x256xbf16>,
    %c0_43 = arith.constant 0 : index
    %c111 = arith.constant 111 : index
    %113 = vector.load %arg6[%c0_43, %c111] : memref<4x512xbf16, #tpu.memory_space<vmem>>, vector<4x256xbf16>
    %114 = vector.broadcast %46 : vector<1x256xbf16> to vector<4x256xbf16>
    %115 = arith.mulf %113, %114 : vector<4x256xbf16>
    %c24 = arith.constant 24 : index
    %c0_44 = arith.constant 0 : index
    %116 = vector.load %arg7[%c24, %c0_44] : memref<112x256xbf16, #tpu.memory_space<vmem>>, vector<4x256xbf16>
    tpu.vector_store %arg7[%c24, %c0_44], %115 {strides = array<i32>} : memref<112x256xbf16, #tpu.memory_space<vmem>>, vector<4x256xbf16>,
    %c0_45 = arith.constant 0 : index
    %c112 = arith.constant 112 : index
    %117 = vector.load %arg6[%c0_45, %c112] : memref<4x512xbf16, #tpu.memory_space<vmem>>, vector<4x256xbf16>
    %118 = vector.broadcast %58 : vector<1x256xbf16> to vector<4x256xbf16>
    %119 = arith.mulf %117, %118 : vector<4x256xbf16>
    %c28 = arith.constant 28 : index
    %c0_46 = arith.constant 0 : index
    %120 = vector.load %arg7[%c28, %c0_46] : memref<112x256xbf16, #tpu.memory_space<vmem>>, vector<4x256xbf16>
    tpu.vector_store %arg7[%c28, %c0_46], %119 {strides = array<i32>} : memref<112x256xbf16, #tpu.memory_space<vmem>>, vector<4x256xbf16>,
    %c0_47 = arith.constant 0 : index
    %c113 = arith.constant 113 : index
    %121 = vector.load %arg6[%c0_47, %c113] : memref<4x512xbf16, #tpu.memory_space<vmem>>, vector<4x256xbf16>
    %122 = vector.broadcast %70 : vector<1x256xbf16> to vector<4x256xbf16>
    %123 = arith.mulf %121, %122 : vector<4x256xbf16>
    %c32 = arith.constant 32 : index
    %c0_48 = arith.constant 0 : index
    %124 = vector.load %arg7[%c32, %c0_48] : memref<112x256xbf16, #tpu.memory_space<vmem>>, vector<4x256xbf16>
    tpu.vector_store %arg7[%c32, %c0_48], %123 {strides = array<i32>} : memref<112x256xbf16, #tpu.memory_space<vmem>>, vector<4x256xbf16>,
    %c0_49 = arith.constant 0 : index
    %c114 = arith.constant 114 : index
    %125 = vector.load %arg6[%c0_49, %c114] : memref<4x512xbf16, #tpu.memory_space<vmem>>, vector<4x256xbf16>
    %126 = vector.broadcast %82 : vector<1x256xbf16> to vector<4x256xbf16>
    %127 = arith.mulf %125, %126 : vector<4x256xbf16>
    %c36 = arith.constant 36 : index
    %c0_50 = arith.constant 0 : index
    %128 = vector.load %arg7[%c36, %c0_50] : memref<112x256xbf16, #tpu.memory_space<vmem>>, vector<4x256xbf16>
    tpu.vector_store %arg7[%c36, %c0_50], %127 {strides = array<i32>} : memref<112x256xbf16, #tpu.memory_space<vmem>>, vector<4x256xbf16>,
    %c0_51 = arith.constant 0 : index
    %c126 = arith.constant 126 : index
    %129 = vector.load %arg6[%c0_51, %c126] : memref<4x512xbf16, #tpu.memory_space<vmem>>, vector<4x256xbf16>
    %130 = vector.broadcast %34 : vector<1x256xbf16> to vector<4x256xbf16>
    %131 = arith.mulf %129, %130 : vector<4x256xbf16>
    %c40 = arith.constant 40 : index
    %c0_52 = arith.constant 0 : index
    %132 = vector.load %arg7[%c40, %c0_52] : memref<112x256xbf16, #tpu.memory_space<vmem>>, vector<4x256xbf16>
    tpu.vector_store %arg7[%c40, %c0_52], %131 {strides = array<i32>} : memref<112x256xbf16, #tpu.memory_space<vmem>>, vector<4x256xbf16>,
    %c0_53 = arith.constant 0 : index
    %c127 = arith.constant 127 : index
    %133 = vector.load %arg6[%c0_53, %c127] : memref<4x512xbf16, #tpu.memory_space<vmem>>, vector<4x256xbf16>
    %134 = vector.broadcast %46 : vector<1x256xbf16> to vector<4x256xbf16>
    %135 = arith.mulf %133, %134 : vector<4x256xbf16>
    %c44 = arith.constant 44 : index
    %c0_54 = arith.constant 0 : index
    %136 = vector.load %arg7[%c44, %c0_54] : memref<112x256xbf16, #tpu.memory_space<vmem>>, vector<4x256xbf16>
    tpu.vector_store %arg7[%c44, %c0_54], %135 {strides = array<i32>} : memref<112x256xbf16, #tpu.memory_space<vmem>>, vector<4x256xbf16>,
    %c0_55 = arith.constant 0 : index
    %c128_56 = arith.constant 128 : index
    %137 = vector.load %arg6[%c0_55, %c128_56] : memref<4x512xbf16, #tpu.memory_space<vmem>>, vector<4x256xbf16>
    %138 = vector.broadcast %58 : vector<1x256xbf16> to vector<4x256xbf16>
    %139 = arith.mulf %137, %138 : vector<4x256xbf16>
    %c48 = arith.constant 48 : index
    %c0_57 = arith.constant 0 : index
    %140 = vector.load %arg7[%c48, %c0_57] : memref<112x256xbf16, #tpu.memory_space<vmem>>, vector<4x256xbf16>
    tpu.vector_store %arg7[%c48, %c0_57], %139 {strides = array<i32>} : memref<112x256xbf16, #tpu.memory_space<vmem>>, vector<4x256xbf16>,
    %c0_58 = arith.constant 0 : index
    %c129 = arith.constant 129 : index
    %141 = vector.load %arg6[%c0_58, %c129] : memref<4x512xbf16, #tpu.memory_space<vmem>>, vector<4x256xbf16>
    %142 = vector.broadcast %70 : vector<1x256xbf16> to vector<4x256xbf16>
    %143 = arith.mulf %141, %142 : vector<4x256xbf16>
    %c52 = arith.constant 52 : index
    %c0_59 = arith.constant 0 : index
    %144 = vector.load %arg7[%c52, %c0_59] : memref<112x256xbf16, #tpu.memory_space<vmem>>, vector<4x256xbf16>
    tpu.vector_store %arg7[%c52, %c0_59], %143 {strides = array<i32>} : memref<112x256xbf16, #tpu.memory_space<vmem>>, vector<4x256xbf16>,
    %c0_60 = arith.constant 0 : index
    %c130 = arith.constant 130 : index
    %145 = vector.load %arg6[%c0_60, %c130] : memref<4x512xbf16, #tpu.memory_space<vmem>>, vector<4x256xbf16>
    %146 = vector.broadcast %82 : vector<1x256xbf16> to vector<4x256xbf16>
    %147 = arith.mulf %145, %146 : vector<4x256xbf16>
    %c56 = arith.constant 56 : index
    %c0_61 = arith.constant 0 : index
    %148 = vector.load %arg7[%c56, %c0_61] : memref<112x256xbf16, #tpu.memory_space<vmem>>, vector<4x256xbf16>
    tpu.vector_store %arg7[%c56, %c0_61], %147 {strides = array<i32>} : memref<112x256xbf16, #tpu.memory_space<vmem>>, vector<4x256xbf16>,
    %c0_62 = arith.constant 0 : index
    %c142 = arith.constant 142 : index
    %149 = vector.load %arg6[%c0_62, %c142] : memref<4x512xbf16, #tpu.memory_space<vmem>>, vector<4x256xbf16>
    %150 = vector.broadcast %34 : vector<1x256xbf16> to vector<4x256xbf16>
    %151 = arith.mulf %149, %150 : vector<4x256xbf16>
    %c60 = arith.constant 60 : index
    %c0_63 = arith.constant 0 : index
    %152 = vector.load %arg7[%c60, %c0_63] : memref<112x256xbf16, #tpu.memory_space<vmem>>, vector<4x256xbf16>
    tpu.vector_store %arg7[%c60, %c0_63], %151 {strides = array<i32>} : memref<112x256xbf16, #tpu.memory_space<vmem>>, vector<4x256xbf16>,
    %c0_64 = arith.constant 0 : index
    %c143 = arith.constant 143 : index
    %153 = vector.load %arg6[%c0_64, %c143] : memref<4x512xbf16, #tpu.memory_space<vmem>>, vector<4x256xbf16>
    %154 = vector.broadcast %46 : vector<1x256xbf16> to vector<4x256xbf16>
    %155 = arith.mulf %153, %154 : vector<4x256xbf16>
    %c64 = arith.constant 64 : index
    %c0_65 = arith.constant 0 : index
    %156 = vector.load %arg7[%c64, %c0_65] : memref<112x256xbf16, #tpu.memory_space<vmem>>, vector<4x256xbf16>
    tpu.vector_store %arg7[%c64, %c0_65], %155 {strides = array<i32>} : memref<112x256xbf16, #tpu.memory_space<vmem>>, vector<4x256xbf16>,
    %c0_66 = arith.constant 0 : index
    %c144 = arith.constant 144 : index
    %157 = vector.load %arg6[%c0_66, %c144] : memref<4x512xbf16, #tpu.memory_space<vmem>>, vector<4x256xbf16>
    %158 = vector.broadcast %58 : vector<1x256xbf16> to vector<4x256xbf16>
    %159 = arith.mulf %157, %158 : vector<4x256xbf16>
    %c68 = arith.constant 68 : index
    %c0_67 = arith.constant 0 : index
    %160 = vector.load %arg7[%c68, %c0_67] : memref<112x256xbf16, #tpu.memory_space<vmem>>, vector<4x256xbf16>
    tpu.vector_store %arg7[%c68, %c0_67], %159 {strides = array<i32>} : memref<112x256xbf16, #tpu.memory_space<vmem>>, vector<4x256xbf16>,
    %c0_68 = arith.constant 0 : index
    %c145 = arith.constant 145 : index
    %161 = vector.load %arg6[%c0_68, %c145] : memref<4x512xbf16, #tpu.memory_space<vmem>>, vector<4x256xbf16>
    %162 = vector.broadcast %70 : vector<1x256xbf16> to vector<4x256xbf16>
    %163 = arith.mulf %161, %162 : vector<4x256xbf16>
    %c72 = arith.constant 72 : index
    %c0_69 = arith.constant 0 : index
    %164 = vector.load %arg7[%c72, %c0_69] : memref<112x256xbf16, #tpu.memory_space<vmem>>, vector<4x256xbf16>
    tpu.vector_store %arg7[%c72, %c0_69], %163 {strides = array<i32>} : memref<112x256xbf16, #tpu.memory_space<vmem>>, vector<4x256xbf16>,
    %c0_70 = arith.constant 0 : index
    %c146 = arith.constant 146 : index
    %165 = vector.load %arg6[%c0_70, %c146] : memref<4x512xbf16, #tpu.memory_space<vmem>>, vector<4x256xbf16>
    %166 = vector.broadcast %82 : vector<1x256xbf16> to vector<4x256xbf16>
    %167 = arith.mulf %165, %166 : vector<4x256xbf16>
    %c76 = arith.constant 76 : index
    %c0_71 = arith.constant 0 : index
    %168 = vector.load %arg7[%c76, %c0_71] : memref<112x256xbf16, #tpu.memory_space<vmem>>, vector<4x256xbf16>
    tpu.vector_store %arg7[%c76, %c0_71], %167 {strides = array<i32>} : memref<112x256xbf16, #tpu.memory_space<vmem>>, vector<4x256xbf16>,
    %c0_72 = arith.constant 0 : index
    %c158 = arith.constant 158 : index
    %169 = vector.load %arg6[%c0_72, %c158] : memref<4x512xbf16, #tpu.memory_space<vmem>>, vector<4x256xbf16>
    %170 = vector.broadcast %34 : vector<1x256xbf16> to vector<4x256xbf16>
    %171 = arith.mulf %169, %170 : vector<4x256xbf16>
    %c80 = arith.constant 80 : index
    %c0_73 = arith.constant 0 : index
    %172 = vector.load %arg7[%c80, %c0_73] : memref<112x256xbf16, #tpu.memory_space<vmem>>, vector<4x256xbf16>
    tpu.vector_store %arg7[%c80, %c0_73], %171 {strides = array<i32>} : memref<112x256xbf16, #tpu.memory_space<vmem>>, vector<4x256xbf16>,
    %c0_74 = arith.constant 0 : index
    %c159 = arith.constant 159 : index
    %173 = vector.load %arg6[%c0_74, %c159] : memref<4x512xbf16, #tpu.memory_space<vmem>>, vector<4x256xbf16>
    %174 = vector.broadcast %46 : vector<1x256xbf16> to vector<4x256xbf16>
    %175 = arith.mulf %173, %174 : vector<4x256xbf16>
    %c84 = arith.constant 84 : index
    %c0_75 = arith.constant 0 : index
    %176 = vector.load %arg7[%c84, %c0_75] : memref<112x256xbf16, #tpu.memory_space<vmem>>, vector<4x256xbf16>
    tpu.vector_store %arg7[%c84, %c0_75], %175 {strides = array<i32>} : memref<112x256xbf16, #tpu.memory_space<vmem>>, vector<4x256xbf16>,
    %c0_76 = arith.constant 0 : index
    %c160 = arith.constant 160 : index
    %177 = vector.load %arg6[%c0_76, %c160] : memref<4x512xbf16, #tpu.memory_space<vmem>>, vector<4x256xbf16>
    %178 = vector.broadcast %58 : vector<1x256xbf16> to vector<4x256xbf16>
    %179 = arith.mulf %177, %178 : vector<4x256xbf16>
    %c88 = arith.constant 88 : index
    %c0_77 = arith.constant 0 : index
    %180 = vector.load %arg7[%c88, %c0_77] : memref<112x256xbf16, #tpu.memory_space<vmem>>, vector<4x256xbf16>
    tpu.vector_store %arg7[%c88, %c0_77], %179 {strides = array<i32>} : memref<112x256xbf16, #tpu.memory_space<vmem>>, vector<4x256xbf16>,
    %c0_78 = arith.constant 0 : index
    %c161 = arith.constant 161 : index
    %181 = vector.load %arg6[%c0_78, %c161] : memref<4x512xbf16, #tpu.memory_space<vmem>>, vector<4x256xbf16>
    %182 = vector.broadcast %70 : vector<1x256xbf16> to vector<4x256xbf16>
    %183 = arith.mulf %181, %182 : vector<4x256xbf16>
    %c92 = arith.constant 92 : index
    %c0_79 = arith.constant 0 : index
    %184 = vector.load %arg7[%c92, %c0_79] : memref<112x256xbf16, #tpu.memory_space<vmem>>, vector<4x256xbf16>
    tpu.vector_store %arg7[%c92, %c0_79], %183 {strides = array<i32>} : memref<112x256xbf16, #tpu.memory_space<vmem>>, vector<4x256xbf16>,
    %c0_80 = arith.constant 0 : index
    %c162 = arith.constant 162 : index
    %185 = vector.load %arg6[%c0_80, %c162] : memref<4x512xbf16, #tpu.memory_space<vmem>>, vector<4x256xbf16>
    %186 = vector.broadcast %82 : vector<1x256xbf16> to vector<4x256xbf16>
    %187 = arith.mulf %185, %186 : vector<4x256xbf16>
    %c96_81 = arith.constant 96 : index
    %c0_82 = arith.constant 0 : index
    %188 = vector.load %arg7[%c96_81, %c0_82] : memref<112x256xbf16, #tpu.memory_space<vmem>>, vector<4x256xbf16>
    tpu.vector_store %arg7[%c96_81, %c0_82], %187 {strides = array<i32>} : memref<112x256xbf16, #tpu.memory_space<vmem>>, vector<4x256xbf16>,
    %c0_83 = arith.constant 0 : index
    %c0_84 = arith.constant 0 : index
    %189 = vector.load %arg3[%c0_83, %c0_84] : memref<8x112xbf16, #tpu.memory_space<vmem>>, vector<8x112xbf16>
    %c0_85 = arith.constant 0 : index
    %c0_86 = arith.constant 0 : index
    %190 = vector.load %arg7[%c0_85, %c0_86] : memref<112x256xbf16, #tpu.memory_space<vmem>>, vector<112x256xbf16>
    %cst_87 = arith.constant dense<0.000000e+00> : vector<8x256xf32>
    %191 = tpu.matmul %189, %190, %cst_87 {dimension_numbers = #tpu.dot_dimension_numbers<[1], [0], [0], [1], [0, 0, 1, 1], [], []>} : vector<8x112xbf16>, vector<112x256xbf16>, vector<8x256xf32> -> vector<8x256xf32>
    %c0_88 = arith.constant 0 : index
    %c0_89 = arith.constant 0 : index
    %192 = vector.load %arg4[%c0_88, %c0_89] : memref<8x1xf32, #tpu.memory_space<vmem>>, vector<8x1xf32>
    %193 = vector.broadcast %192 : vector<8x1xf32> to vector<8x256xf32>
    %194 = arith.addf %191, %193 : vector<8x256xf32>
    %c0_90 = arith.constant 0 : index
    %c0_91 = arith.constant 0 : index
    %195 = memref.load %arg1[%c0_90, %c0_91] : memref<1x1xf32, #tpu.memory_space<smem>>
    %196 = vector.broadcast %195 : f32 to vector<8x256xf32>
    %197 = arith.mulf %194, %196 : vector<8x256xf32>
    %c0_92 = arith.constant 0 : index
    %c0_93 = arith.constant 0 : index
    %c0_94 = arith.constant 0 : index
    %198 = vector.load %arg5[%c0_92, %c0_93, %c0_94] : memref<1x8x256xf32, #tpu.memory_space<vmem>>, vector<1x8x256xf32>
    %199 = vector.shape_cast %198 : vector<1x8x256xf32> to vector<8x256xf32>
    %200 = vector.shape_cast %197 : vector<8x256xf32> to vector<1x8x256xf32>
    tpu.vector_store %arg5[%c0_92, %c0_93, %c0_94], %200 {strides = array<i32>} : memref<1x8x256xf32, #tpu.memory_space<vmem>>, vector<1x8x256xf32>,
    return
  }
  func.func @transform_0(%arg0: i32) -> (i32, i32) {
    %c0_i32 = arith.constant 0 : i32
    %c0_i32_0 = arith.constant 0 : i32
    %c0_i32_1 = arith.constant 0 : i32
    return %c0_i32, %c0_i32_0 : i32, i32
  }
  func.func @transform_1(%arg0: i32) -> (i32, i32, i32) {
    %c0_i32 = arith.constant 0 : i32
    %c0_i32_0 = arith.constant 0 : i32
    %c0_i32_1 = arith.constant 0 : i32
    return %arg0, %c0_i32, %c0_i32_0 : i32, i32, i32
  }
  func.func @transform_2(%arg0: i32) -> (i32, i32) {
    %c0_i32 = arith.constant 0 : i32
    %c0_i32_0 = arith.constant 0 : i32
    %c0_i32_1 = arith.constant 0 : i32
    return %c0_i32, %c0_i32_0 : i32, i32
  }
  func.func @transform_3(%arg0: i32) -> (i32, i32) {
    %c0_i32 = arith.constant 0 : i32
    %c0_i32_0 = arith.constant 0 : i32
    %c0_i32_1 = arith.constant 0 : i32
    return %c0_i32, %c0_i32_0 : i32, i32
  }
  func.func @transform_4(%arg0: i32) -> (i32, i32, i32) {
    %c0_i32 = arith.constant 0 : i32
    %c0_i32_0 = arith.constant 0 : i32
    %c0_i32_1 = arith.constant 0 : i32
    return %arg0, %c0_i32, %c0_i32_0 : i32, i32, i32
  }
}

</mosaic_0001>

<bundles_post_ra>
// kernel: tpu_custom_call.1
= control target key start
LH: loop header
LB: loop body
LE: loop exit
PB: predicated region body
PF: predicated region fallthrough
CT: control target
= control target key end

     0   :  { %s2275_s0 = inlined_call_operand.<no memory space> [shape: f32[1,1], index: 0, kind: input, shape index: {}]   ;;  %s2276_s1 = inlined_call_operand.hbm [shape: f32[2,4,256], index: 1, kind: input, shape index: {}]   ;;  %s2277_s2 = inlined_call_operand.vmem [shape: bf16[8,112], index: 2, kind: input, shape index: {}]   ;;  %s2278_s3 = inlined_call_operand.vmem [shape: f32[8,1], index: 3, kind: input, shape index: {}]   ;;  %s2279_s4 = inlined_call_operand.hbm [shape: f32[2,8,256], index: 4, kind: output, shape index: {}]  }
   0x1   :  { %9 = sst [smem:[#allocation4]] %s2275_s0 }
   0x2   :  { %10 = vsyncpa [#allocation6], 0 }
   0x3   :  { %12 = vsyncpa [#allocation6 + $0x1], 0 }
   0x4   :  { %13 = vsyncpa [#allocation7], 0 }
   0x5   :  { %15 = vsyncpa [#allocation7 + $0x1], 0  ;;  %s1720_s17 = smov 0   ;;  %s1722_s18 = smov 0  }
   0x6   :  { %s1724_s19 = smov 0   ;;  %s1726_s20 = smov 0  }
   0x7 LB: > { %s1741_s0 = sadd.s32 4294967295, %s1660_s20   ;;  %s1457_s21 = sadd.s32 4294967294, %s1660_s20   ;;  %s1660_s20 = sphi %s1726_s20, %s2339_s20   ;;  %s1656_s19 = sphi %s1724_s19, %s2338_s19   ;;  %s1652_s18 = sphi %s1722_s18, %s2337_s18   ;;  %s1648_s17 = sphi %s1720_s17, %s2336_s17  }
   0x8   : > { %s1745_s22 = sadd.s32 1, %s1660_s20   ;;  %s49_s23 = sadd.s32 1, %s1656_s19 }
   0x9   : > { %s46_s24 = ssub.s32 %s1660_s20, %s1745_s22  ;;  %p56_p0 = scmp.ne.s32.totalorder %s1656_s19, %s1652_s18 }
   0xa   : > { %p47_p1 = scmp.eq.s32.totalorder %s46_s24, 0  ;;  %p57_p2 = scmp.eq.s32.totalorder %s1660_s20, 0 }
   0xb   : > { %p62_p3 = scmp.ne.s32.totalorder %s1652_s18, %s1648_s17  ;;  %p63_p4 = scmp.eq.s32.totalorder %s1741_s0, 0 }
   0xc   : > { %s1757_s25 = scalar_select %p47_p1, %s1656_s19, %s49_s23  }
   0xd   : > { %p1759_p5 = por %p57_p2, %p56_p0  ;;  %p1763_p6 = por %p63_p4, %p62_p3 }
   0xe   : > { %p128_p7 = scmp.eq.s32.totalorder %s1741_s0, 1  ;;  %p134_p8 = scmp.eq.s32.totalorder %s1457_s21, 1 }
   0xf   : > { %p1501_p10 = scmp.lt.s32.totalorder %s1660_s20, 2  ;;  %s163_s30 = sand.u32 1, %s1656_s19  }
  0x10   : > { %p1770_p11 = por %p128_p7, %p56_p0  ;;  %p1774_p12 = por %p134_p8, %p62_p3 }
  0x11   : > { %s1487_s5 = sshll.u32 %s1660_s20, 7  ;;  %s1460_s6 = sshll.u32 %s163_s30, 3 }
  0x12   : > { %s2305_s28 = scalar_select %p1770_p11, 1, 0 }
  0x13   : > { %s2306_s29 = scalar_select %p1774_p12, 1, 0 }
  0x14   : > { %s1783_s9 = scalar_lea.hbm %s2276_s1, %s1487_s5  ;;  %s167_s10 = scalar_lea.vmem [#allocation5], %s1460_s6 }
  0x15   : > { %s175_s11 = sshll.u32 %s167_s10, 4  ;;  %p1787_p13 = pnand %p1501_p10, %p1759_p5  ;;  %s1791_s11 = int_to_ptr.vmem [resolvable:$true] %s175_s11 }
  0x16   : > { %s164_s13 = scalar_lea.sflag [#allocation6], %s163_s30  ;;  %s1564_s14 = scalar_lea.hbm %s1783_s9, 128 }
  0x17   : > { %p1565_p2 = scmp.ne.s32.totalorder %s1783_s9, %s1564_s14  ;;  %p1566_p3 = pneg %p1787_p13 }
  0x18   : > { %s1569_s21 = scalar_lea.hbm %s2276_s1, 256  ;;  %p1570_p5 = scmp.lt.u32.totalorder %s1783_s9, %s2276_s1 }
  0x19   : > { %p1567_p4 = pnand %p1566_p3, %p1565_p2  ;;  %p1571_p8 = scmp.lt.u32.totalorder %s1569_s21, %s1564_s14 }
  0x1a   : > { %p1573_p9 = scmp.lt.u32.totalorder %s1564_s14, %s1783_s9 }
  0x1b   : > { %p1568_p7 = pneg %p1567_p4  ;;  %p1572_p10 = por %p1571_p8, %p1570_p5 }
  0x1d   : > { %p1574_p0 = por %p1573_p9, %p1572_p10 }
  0x1f   : > { %p1575_p1 = pnand %p1574_p0, %p1568_p7 }
  0x21   : > { %1578 = shalt.err (!%p1575_p1)
}
  0x22   : > { %s1579_s26 = scalar_lea.vmem %s1791_s11, 128  ;;  %s1662_s30 = smov [#allocation5]  }
  0x23   : > { %p1580_p2 = scmp.ne.s32.totalorder %s1791_s11, %s1579_s26  ;;  %s1584_s5 = sshll.u32 %s1662_s30, 4  ;;  %s1585_s5 = int_to_ptr.vmem [resolvable:$false] %s1584_s5 }
  0x24   : > { %s1586_s6 = scalar_lea.vmem %s1585_s5, 256  ;;  %p1587_p11 = scmp.lt.s32.totalorder %s1791_s11, %s1585_s5 }
  0x25   : > { %p1582_p4 = pnand %p1580_p2, %p1566_p3  ;;  %p1588_p5 = scmp.lt.s32.totalorder %s1586_s6, %s1579_s26 }
  0x27   : > { %p1583_p12 = pneg %p1582_p4  ;;  %p1589_p8 = por %p1588_p5, %p1587_p11 }
  0x29   : > { %p1590_p9 = pnand %p1589_p8, %p1583_p12 }
  0x2b   : > { %1593 = shalt.err (!%p1590_p9)
}
  0x2c   : > { %1496 = dma.hbm_to_vmem [thread:$0]  (!%p1787_p13), %s1783_s9, 128, %s1791_s11, %s164_s13  }
  0x2d   : > { %p2308_p0 = scmp.lt.s32.totalorder %s1660_s20, 3  ;;  %p2309_p1 = scmp.ge.s32.totalorder %s1660_s20, 1 }
  0x2f   : > { %p181_p3 = pnand %p2309_p1, %p2308_p0 }
  0x30   : > { %s1825_s7 = sand.u32 (!%p181_p3), 1, %s1652_s18   ;;  %v220_v0 = vlaneseq (!%p181_p3)  ;;  %v1663_v1 = vmov (!%p181_p3), 1983009808  }
  0x31   : > { %184 = sbr.rel (%p181_p3) target bundleno = 711 (0x2c7), region = 36  ;;  %s1464_s8 = sshll.u32 (!%p181_p3), %s1825_s7, 3  ;;  %v339_v2 = vunpack.c.l.s4 (!%p181_p3), %v1663_v1 }
  0x32   : > { %s187_s10 = scalar_lea.sflag (!%p181_p3), [#allocation6], %s1825_s7  ;;  %s1829_s14 = scalar_lea.vmem (!%p181_p3), [#allocation5], %s1464_s8 }
  0x38   : > { %1639 = dma.done.wait (%p1763_p6), %s187_s10, 128  }
  0x39   : > { %1641 = vsyncadd (%p1763_p6), %s187_s10, 4294967168  ;;  %v342_v3 = vshrl.u32 %v220_v0, 7  ;;  %v221_v4 = vand.u32 127, %v220_v0  ;;  %v340_v5 = vunpack.c.0.s8 %v339_v2  ;;  %v1664_v6 = vmov 1.0|1.0   ;;  %s2285_s27 = smov 96  }
  0x3a   : > { %v433_v7 = vcombine.low %v1664_v6, %v1664_v6  ;;  %v1665_v8 = vmov 0   ;;  %v1667_v20 = vmov 0.0   ;;  %v315_v26 = vld [vmem:[%s1829_s14] sm:$0xff]  ;;  %s1668_s9 = smov 112   ;;  %s2287_s11 = smov 97   ;;  %vm2297_vm8 = vcmask 785408  }
  0x3b   : > { %216 = vst [vmem:[#allocation2] sm:$0x3] %v1665_v8  ;;  %217 = vst [vmem:[#allocation2 + $0x6] sm:$0x3] %v1665_v8  ;;  %1357 = vmatprep.mubr.bf16.mxu0 %v1665_v8  ;;  %1563 = vset.pattern.permute.xlu0 %v1665_v8  ;;  %v222_v9 = vadd.s32 128, %v221_v4  ;;  %v227_v10 = vand.u32 15, %v221_v4  ;;  %v1835_v11 = vsub.s32 %v340_v5, %v342_v3 }
  0x3c   : > { %218 = vst [vmem:[#allocation3 + $0x60] sm:$0xfc] %v1665_v8  ;;  %219 = vst [vmem:[#allocation3 + $0x68] sm:$0xfc] %v1665_v8  ;;  %v316_v33 = vmax.f32 %v315_v26, 0.0  ;;  %s2283_s12 = smov 95  }
  0x3d   : > { %v234_v12 = vand.u32 15, %v222_v9  ;;  %v287_v13 = vadd.s32 1, %v227_v10  ;;  %v247_v14 = vadd.s32 4294967294, %v227_v10  ;;  %v261_v15 = vadd.s32 4294967295, %v227_v10  ;;  %s2281_s13 = smov 94   ;;  %s2291_s15 = smov 110  }
  0x3e   : > { %v1838_v16 = vrot.slane %v433_v7, %v1835_v11  ;;  %v301_v17 = vadd.s32 2, %v227_v10  ;;  %v318_v36 = vcombine.high %v316_v33, %v316_v33  ;;  %s2293_s16 = smov 111   ;;  %s1674_s21 = smov 114   ;;  %vm657_vm9 = vcmask 916480  }
  0x3f   : > { %v288_v18 = vadd.s32 1, %v234_v12  ;;  %vm291_vm0 = vcmp.lt.s32.totalorder %v287_v13, 16  ;;  %v248_v19 = vadd.s32 4294967294, %v234_v12  ;;  %vm249_vm1 = vcmp.ge.s32.totalorder %v247_v14, 0  ;;  %s2289_s23 = smov 98   ;;  %s1676_s24 = smov 127  }
  0x40   : > { %441 = vrot.lane.b32.xlu0 %v1838_v16, %s2285_s27  ;;  %v1470_v21 = vsel %vm291_vm0, 1.0, %v1667_v20  ;;  %v1466_v22 = vsel %vm249_vm1, 1.0, %v1667_v20  ;;  %v262_v23 = vadd.s32 4294967295, %v234_v12  ;;  %vm263_vm2 = vcmp.ge.s32.totalorder %v261_v15, 0  ;;  %s1677_s26 = smov 126   ;;  %s1678_s30 = smov 1  }
  0x41   : > { %vm292_vm3 = vcmp.lt.s32.totalorder %v288_v18, 16  ;;  %vm250_vm4 = vcmp.ge.s32.totalorder %v248_v19, 0  ;;  %v1468_v24 = vsel %vm263_vm2, 1.0, %v1667_v20  ;;  %v302_v25 = vadd.s32 2, %v234_v12  ;;  %s1679_s5 = smov 113   ;;  %s1680_s6 = smov 14  }
  0x42   : > { %v1471_v27 = vsel %vm292_vm3, 1.0, %v1667_v20  ;;  %v1467_v28 = vsel %vm250_vm4, 1.0, %v1667_v20  ;;  %vm264_vm5 = vcmp.ge.s32.totalorder %v262_v23, 0  ;;  %vm305_vm6 = vcmp.lt.s32.totalorder %v301_v17, 16  ;;  %s1681_s8 = smov 2   ;;  %s1682_s10 = smov 17  }
  0x43   : > { %v1478_v29 = vpack.c.bf16 %v1471_v27, %v1470_v21  ;;  %v1476_v30 = vpack.c.bf16 %v1467_v28, %v1466_v22  ;;  %v1469_v31 = vsel %vm264_vm5, 1.0, %v1667_v20  ;;  %vm306_vm7 = vcmp.lt.s32.totalorder %v302_v25, 16  ;;  %s1683_s14 = smov 16   ;;  %s1686_s27 = smov 32  }
  0x44   : > { %654 = vrot.lane.b32.xlu0 %v1838_v16, %s1668_s9  ;;  %v1477_v32 = vpack.c.bf16 %v1469_v31, %v1468_v24  ;;  %v1472_v38 = vsel %vm305_vm6, 1.0, %v1667_v20  ;;  %v1473_v39 = vsel %vm306_vm7, 1.0, %v1667_v20  ;;  %v1474_v40 = vpack.c.bf16 %v318_v36, %v316_v33  ;;  %p2333_p11 = scmp.ne.s32.totalorder %s2305_s28, 0 }
  0x45   : > { %v489_v34 = vrot.slane %v1478_v29, %v1835_v11  ;;  %v344_v37 = vrot.slane %v1476_v30, %v1835_v11  ;;  %v1479_v41 = vpack.c.bf16 %v1473_v39, %v1472_v38  ;;  %vm2295_vm10 = vcmask 769024  }
  0x46   : > { %v392_v35 = vrot.slane %v1477_v32, %v1835_v11  ;;  %1475 = vst.sshfl [vmem:[#allocation2 + $0x2] sm:$0x33 pattern:$0x76325410] %v1474_v40  ;;  %vm2301_vm11 = vcmask 908288   ;;  %vm2299_vm12 = vcmask 801792  }
  0x47   : > { %490 = vrot.lane.b32.xlu1 %v489_v34, %s2287_s11  ;;  %v538_v42 = vrot.slane %v1479_v41, %v1835_v11  ;;  %s1687_s11 = smov 31   ;;  %vm772_vm13 = vcmask 1031168   ;;  %vm2302_vm14 = vcmask 924672   ;;  %vm800_vm15 = vcmask 15360  }
  0x48   : > { %393 = vrot.lane.b32.xlu0 %v392_v35, %s2283_s12  ;;  %s1685_s12 = smov 18   ;;  %vm2298_vm0 = vcmask 793600   ;;  %vm685_vm1 = vcmask 130048   ;;  %vm2296_vm2 = vcmask 777216   ;;  %vm2300_vm3 = vcmask 900096  }
  0x49   : > { %vm734_vm4 = vcmask 932864   ;;  %vm811_vm5 = vcmask 1039360   ;;  %vm839_vm6 = vcmask 7168   ;;  %vm761_vm7 = vcmask 113664  }
  0x4b   : > { %345 = vrot.lane.b32.xlu1 %v344_v37, %s2281_s13  ;;  %s1684_s13 = smov 15  }
  0x4c   : > { %577 = vrot.lane.b32.xlu0 %v344_v37, %s2291_s15  ;;  %s1689_s15 = smov 33  }
  0x4d   : > { %v430_v44 = vld [vmem:[#allocation2] sm:$0x3f] }
  0x4e   : > { %v653_v49 = vld [vmem:[#allocation2] sm:$0x3f] }
  0x4f   : > { %615 = vrot.lane.b32.xlu1 %v392_v35, %s2293_s16  ;;  %s1690_s16 = smov 34   ;;  %v334_v61 = vld [vmem:[#allocation2] sm:$0x3f] }
  0x50   : > { %731 = vrot.lane.b32.xlu0 %v538_v42, %s1674_s21  ;;  %v614_v5 = vld [vmem:[#allocation2] sm:$0x3f] }
  0x51   : > { %v528_v14 = vld [vmem:[#allocation2] sm:$0x3f] }
  0x52   : > { %v768_v21 = vld [vmem:[#allocation2] sm:$0x3f] }
  0x53   : > { %539 = vrot.lane.b32.xlu1 %v538_v42, %s2289_s23  ;;  %s1688_s23 = smov 30   ;;  %v692_v28 = vld [vmem:[#allocation2] sm:$0x3f] }
  0x54   : > { %808 = vrot.lane.b32.xlu0 %v392_v35, %s1676_s24  ;;  %v898_v36 = vld [vmem:[#allocation2 + $0x2] sm:$0x3f] }
  0x55   : > { %v479_v40 = vld [vmem:[#allocation2] sm:$0x3f] }
  0x57   : > { %769 = vrot.lane.b32.xlu1 %v344_v37, %s1677_s26 }
  0x58   : > { %863 = vrot.lane.b32.xlu0 %v489_v34, %s1678_s30 }
  0x5b   : > { %693 = vrot.lane.b32.xlu1 %v489_v34, %s1679_s5 }
  0x5c   : > { %936 = vrot.lane.b32.xlu0 %v344_v37, %s1680_s6 }
  0x5f   : > { %899 = vrot.lane.b32.xlu1 %v538_v42, %s1681_s8 }
  0x60   : > { %1045 = vrot.lane.b32.xlu0 %v489_v34, %s1682_s10 }
  0x63   : > { %1009 = vrot.lane.b32.xlu1 %v1838_v16, %s1683_s14 }
  0x64   : > { %973 = vrot.lane.b32.xlu0 %v392_v35, %s1684_s13 }
  0x67   : > { %1082 = vrot.lane.b32.xlu1 %v538_v42, %s1685_s12 }
  0x68   : > { %1191 = vrot.lane.b32.xlu0 %v1838_v16, %s1686_s27 }
  0x6b   : > { %1155 = vrot.lane.b32.xlu1 %v392_v35, %s1687_s11 }
  0x6c   : > { %1119 = vrot.lane.b32.xlu0 %v344_v37, %s1688_s23 }
  0x6f   : > { %1228 = vrot.lane.b32.xlu1 %v489_v34, %s1689_s15 }
  0x73   : > { %1265 = vrot.lane.b32.xlu1 %v538_v42, %s1690_s16 }
  0xb2   : > { %v442_v43 = vpop.permute.xlu0 %441 }
  0xb3   : > { %v443_v45 = vrot.slane %v442_v43, 6 }
  0xb5   : > { %v445_v46 = vsel %vm2297_vm8, %v443_v45, %v442_v43  ;;  %vm607_vm8 = vcmask 146432  }
  0xb6   : > { %v447_v47 = vmul.bf16 %v445_v46, %v430_v44  ;;  %v655_v48 = vpop.permute.xlu0 %654  ;;  %v1008_v44 = vld [vmem:[#allocation2 + $0x2] sm:$0x3f] }
  0xb7   : > { %v656_v50 = vrot.slane %v655_v48, 6 }
  0xb8   : > { %v449_v51 = vcombine.high %v447_v47, %v447_v47  ;;  %v456_v52 = vrot.slane %v447_v47, %v1835_v11 }
  0xb9   : > { %v658_v53 = vsel %vm657_vm9, %v656_v50, %v655_v48  ;;  %v1876_v54 = vpop.permute.xlu1 %490 }
  0xba   : > { %v660_v55 = vmul.bf16 %v658_v53, %v653_v49  ;;  %468 = vrot.lane.b32.xlu0 %v456_v52, %s1686_s27  ;;  %v464_v56 = vcombine.low %v456_v52, %v456_v52  ;;  %v463_v59 = vrot.slane %v449_v51, %v1835_v11  ;;  %v394_v10 = vpop.permute.xlu0 %393  ;;  %v492_v33 = vrot.slane %v1876_v54, 6 }
  0xbb   : > { %v395_v50 = vrot.slane %v394_v10, 6 }
  0xbc   : > { %v662_v57 = vcombine.low %v660_v55, %v660_v55  ;;  %v676_v58 = vrot.slane %v660_v55, %v1835_v11  ;;  %v465_v2 = vcombine.low %v463_v59, %v463_v59  ;;  %v494_v41 = vsel %vm2298_vm0, %v492_v33, %v1876_v54  ;;  %v382_v54 = vld [vmem:[#allocation2] sm:$0x3f] }
  0xbd   : > { %v346_v60 = vpop.permute.xlu1 %345  ;;  %v1942_v48 = vmul.bf16 %v494_v41, %v479_v40  ;;  %v397_v55 = vsel %vm2296_vm2, %v395_v50, %v394_v10  ;;  %vm646_vm2 = vcmask 138240   ;;  %vm569_vm0 = vcmask 244736  }
  0xbe   : > { %v347_v62 = vrot.slane %v346_v60, 6  ;;  %466 = vrot.lane.b32.xlu0 %v464_v56, %s1686_s27  ;;  %v669_v63 = vrot.slane %v662_v57, %v1835_v11  ;;  %v678_v0 = vcombine.low %v676_v58, %v676_v58  ;;  %v578_v23 = vpop.permute.xlu0 %577 }
  0xbf   : > { %v498_v53 = vcombine.low %v1942_v48, %v1942_v48  ;;  %v579_v56 = vrot.slane %v578_v23, 6 }
  0xc0   : > { %v349_v1 = vsel %vm2295_vm10, %v347_v62, %v346_v60  ;;  %683 = vrot.lane.b32.xlu1 %v678_v0, %s1683_s14  ;;  %v677_v9 = vcombine.low %v669_v63, %v669_v63  ;;  %v1960_v60 = vmul.bf16 %v397_v55, %v382_v54  ;;  %v576_v62 = vld [vmem:[#allocation2] sm:$0x3f]  ;;  %vm723_vm10 = vcmask 121856  }
  0xc1   : > { %v1885_v3 = vmul.bf16 %v349_v1, %v334_v61  ;;  %v616_v4 = vpop.permute.xlu1 %615  ;;  %v1966_v1 = vrot.slane %v498_v53, %v1835_v11 }
  0xc2   : > { %v617_v6 = vrot.slane %v616_v4, 6  ;;  %681 = vrot.lane.b32.xlu0 %v669_v63, %s1683_s14  ;;  %v732_v32 = vpop.permute.xlu0 %731  ;;  %v581_v63 = vsel %vm2300_vm3, %v579_v56, %v578_v23  ;;  %v862_v23 = vld [vmem:[#allocation2 + $0x2] sm:$0x3f]  ;;  %v401_v50 = vcombine.low %v1960_v60, %v1960_v60  ;;  %vm521_vm3 = vcmask 252928  }
  0xc3   : > { %v1890_v7 = vrot.slane %v1885_v3, %v1835_v11  ;;  %v733_v0 = vrot.slane %v732_v32, 6 }
  0xc4   : > { %v619_v8 = vsel %vm2301_vm11, %v617_v6, %v616_v4  ;;  %470 = vrot.lane.b32.xlu1 %v465_v2, %s1686_s27  ;;  %v415_v6 = vrot.slane %v1960_v60, %v1835_v11  ;;  %s2310_s27 = smov 111   ;;  %vm423_vm11 = vcmask 269312  }
  0xc5   : > { %v1894_v12 = vmul.bf16 %v619_v8, %v614_v5  ;;  %v540_v13 = vpop.permute.xlu1 %539  ;;  %v368_v57 = vcombine.high %v1890_v7, %v1890_v7  ;;  %v1971_v5 = vmul.bf16 %v581_v63, %v576_v62  ;;  %v735_v8 = vsel %vm734_vm4, %v733_v0, %v732_v32 }
  0xc6   : > { %v541_v15 = vrot.slane %v540_v13, 6  ;;  %369 = vrot.lane.b32.xlu0 %v1890_v7, %s1690_s16  ;;  %v809_v46 = vpop.permute.xlu0 %808  ;;  %v730_v7 = vld [vmem:[#allocation2] sm:$0x3f] }
  0xc7   : > { %v1900_v17 = vrot.slane %v1894_v12, %v1835_v11  ;;  %v810_v4 = vrot.slane %v809_v46, 6 }
  0xc8   : > { %v543_v18 = vsel %vm2299_vm12, %v541_v15, %v540_v13  ;;  %679 = vrot.lane.b32.xlu1 %v677_v9, %s1683_s14  ;;  %v807_v13 = vld [vmem:[#allocation2] sm:$0x3f]  ;;  %vm472_vm12 = vcmask 261120  }
  0xc9   : > { %v1904_v19 = vmul.bf16 %v543_v18, %v528_v14  ;;  %v770_v20 = vpop.permute.xlu1 %769  ;;  %v812_v14 = vsel %vm811_vm5, %v810_v4, %v809_v46  ;;  %v1983_v18 = vmul.bf16 %v735_v8, %v730_v7 }
  0xca   : > { %v771_v22 = vrot.slane %v770_v20, 6  ;;  %642 = vrot.lane.b32.xlu0 %v1900_v17, %s1682_s10  ;;  %v864_v58 = vpop.permute.xlu0 %863 }
  0xcb   : > { %v1910_v24 = vrot.slane %v1904_v19, %v1835_v11  ;;  %v865_v10 = vrot.slane %v864_v58, 6 }
  0xcc   : > { %v773_v25 = vsel %vm772_vm13, %v771_v22, %v770_v20  ;;  %v599_v20 = vrot.slane %v1971_v5, %v1835_v11  ;;  %v814_v22 = vmul.bf16 %v812_v14, %v807_v13 }
  0xcd   : > { %v1913_v26 = vmul.bf16 %v773_v25, %v768_v21  ;;  %v694_v27 = vpop.permute.xlu1 %693  ;;  %v562_v9 = vcombine.high %v1910_v24, %v1910_v24  ;;  %v638_v25 = vcombine.low %v1900_v17, %v1900_v17 }
  0xce   : > { %v695_v29 = vrot.slane %v694_v27, 6  ;;  %563 = vrot.lane.b32.xlu0 %v1910_v24, %s1688_s23  ;;  %v937_v2 = vpop.permute.xlu0 %936  ;;  %v866_v24 = vsel %vm839_vm6, %v865_v10, %v864_v58  ;;  %v816_v32 = vcombine.low %v814_v22, %v814_v22  ;;  %v830_v0 = vrot.slane %v814_v22, %v1835_v11  ;;  %v1044_v10 = vld [vmem:[#allocation2 + $0x2] sm:$0x3f] }
  0xcf   : > { %v1919_v30 = vrot.slane %v1913_v26, %v1835_v11  ;;  %v938_v21 = vrot.slane %v937_v2, 6 }
  0xd0   : > { %v697_v31 = vsel %vm2302_vm14, %v695_v29, %v694_v27  ;;  %v868_v27 = vmul.bf16 %v866_v24, %v862_v23  ;;  %v935_v29 = vld [vmem:[#allocation2 + $0x2] sm:$0x3f]  ;;  %v2003_v40 = vrot.slane %v816_v32, %v1835_v11  ;;  %vm375_vm14 = vcmask 277504  }
  0xd1   : > { %v1923_v34 = vmul.bf16 %v697_v31, %v692_v28  ;;  %v900_v35 = vpop.permute.xlu1 %899  ;;  %v753_v28 = vrot.slane %v1983_v18, %v1835_v11  ;;  %v939_v31 = vsel %vm761_vm7, %v938_v21, %v937_v2  ;;  %v1081_v23 = vld [vmem:[#allocation2 + $0x2] sm:$0x3f] }
  0xd2   : > { %v901_v37 = vrot.slane %v900_v35, 6  ;;  %796 = vrot.lane.b32.xlu0 %v1919_v30, %s1681_s8  ;;  %v1981_v15 = vpop.permute.xlu0 %1045  ;;  %v941_v17 = vmul.bf16 %v939_v31, %v935_v29  ;;  %v870_v53 = vcombine.low %v868_v27, %v868_v27 }
  0xd3   : > { %v1929_v38 = vrot.slane %v1923_v34, %v1835_v11 }
  0xd4   : > { %v902_v39 = vsel %vm800_vm15, %v901_v37, %v900_v35  ;;  %v884_v37 = vrot.slane %v868_v27, %v1835_v11  ;;  %v943_v41 = vcombine.low %v941_v17, %v941_v17  ;;  %v877_v55 = vrot.slane %v870_v53, %v1835_v11 }
  0xd5   : > { %v1934_v42 = vmul.bf16 %v902_v39, %v898_v36  ;;  %v1010_v43 = vpop.permute.xlu1 %1009  ;;  %v716_v33 = vcombine.high %v1929_v38, %v1929_v38  ;;  %v353_v36 = vcombine.high %v1885_v3, %v1885_v3  ;;  %v512_v3 = vrot.slane %v1942_v48, %v1835_v11 }
  0xd6   : > { %v1011_v45 = vrot.slane %v1010_v43, 6  ;;  %717 = vrot.lane.b32.xlu0 %v1929_v38, %s1684_s13  ;;  %v974_v35 = vpop.permute.xlu0 %973  ;;  %v408_v48 = vrot.slane %v401_v50, %v1835_v11  ;;  %v957_v14 = vrot.slane %v941_v17, %v1835_v11  ;;  %v885_v21 = vcombine.high %v877_v55, %v877_v55 }
  0xd7   : > { %v1940_v47 = vrot.slane %v1934_v42, %v1835_v11  ;;  %v975_v39 = vrot.slane %v974_v35, 6  ;;  %v367_v38 = vrot.slane %v353_v36, %v1835_v11 }
  0xd8   : > { %v1012_v49 = vsel %vm685_vm1, %v1011_v45, %v1010_v43  ;;  %v972_v43 = vld [vmem:[#allocation2 + $0x2] sm:$0x3f]  ;;  %v792_v45 = vcombine.low %v1919_v30, %v1919_v30  ;;  %v547_v30 = vcombine.high %v1904_v19, %v1904_v19  ;;  %v701_v19 = vcombine.high %v1923_v34, %v1923_v34 }
  0xd9   : > { %v1945_v51 = vmul.bf16 %v1012_v49, %v1008_v44  ;;  %v976_v44 = vsel %vm723_vm10, %v975_v39, %v974_v35  ;;  %v950_v49 = vrot.slane %v943_v41, %v1835_v11  ;;  %v416_v62 = vcombine.high %v408_v48, %v408_v48  ;;  %v846_v34 = vld [vmem:[#allocation2 + $0x2] sm:$0xf] }
  0xda   : > { %925 = vrot.lane.b32.xlu0 %v1940_v47, %s1677_s26  ;;  %v978_v46 = vmul.bf16 %v976_v44, %v972_v43  ;;  %v561_v58 = vrot.slane %v547_v30, %v1835_v11  ;;  %v715_v63 = vrot.slane %v701_v19, %v1835_v11  ;;  %v848_v7 = vmul.bf16 %v846_v34, %v1838_v16  ;;  %v1192_v16 = vpop.permute.xlu0 %1191  ;;  %v1118_v44 = vld [vmem:[#allocation2 + $0x2] sm:$0x3f] }
  0xdb   : > { %v1016_v52 = vcombine.low %v1945_v51, %v1945_v51  ;;  %v959_v22 = vcombine.low %v957_v14, %v957_v14  ;;  %v921_v29 = vcombine.low %v1940_v47, %v1940_v47  ;;  %v1030_v31 = vrot.slane %v1945_v51, %v1835_v11 }
  0xdc   : > { %v980_v54 = vcombine.high %v978_v46, %v978_v46  ;;  %1480 = vst.sshfl [vmem:[#allocation3 + $0x30] sm:$0x3 pattern:$0x76325410] %v848_v7  ;;  %v623_v35 = vcombine.high %v1894_v12, %v1894_v12  ;;  %v777_v12 = vcombine.high %v1913_v26, %v1913_v26  ;;  %v1193_v43 = vrot.slane %v1192_v16, 6 }
  0xdd   : > { %v1957_v59 = vrot.slane %v1016_v52, %v1835_v11  ;;  %v514_v52 = vcombine.low %v512_v3, %v512_v3 }
  0xde   : > { %371 = vrot.lane.b32.xlu0 %v368_v57, %s1690_s16  ;;  %v994_v56 = vrot.slane %v980_v54, %v1835_v11  ;;  %v585_v57 = vcombine.low %v1971_v5, %v1971_v5  ;;  %v1047_v5 = vrot.slane %v1981_v15, 6  ;;  %v637_v41 = vrot.slane %v623_v35, %v1835_v11 }
  0xdf   : > { %v1031_v61 = vcombine.high %v1957_v59, %v1957_v59  ;;  %v791_v53 = vrot.slane %v777_v12, %v1835_v11 }
  0xe0   : > { %v592_v60 = vrot.slane %v585_v57, %v1835_v11  ;;  %v1048_v13 = vsel %vm646_vm2, %v1047_v5, %v1981_v15 }
  0xe1   : > { %1034 = vrot.lane.b32.xlu1 %v1031_v61, %s1668_s9  ;;  %v739_v61 = vcombine.low %v1983_v18, %v1983_v18  ;;  %v793_v19 = vcombine.low %v791_v53, %v791_v53 }
  0xe2   : > { %517 = vrot.lane.b32.xlu0 %v1966_v1, %s1687_s11  ;;  %v600_v2 = vcombine.high %v592_v60, %v592_v60 }
  0xe3   : > { %v746_v4 = vrot.slane %v739_v61, %v1835_v11 }
  0xe5   : > { %421 = vrot.lane.b32.xlu1 %v415_v6, %s1689_s15  ;;  %v832_v6 = vcombine.low %v830_v0, %v830_v0  ;;  %v754_v8 = vcombine.high %v746_v4, %v746_v4 }
  0xe6   : > { %565 = vrot.lane.b32.xlu0 %v562_v9, %s1688_s23  ;;  %v1083_v9 = vpop.permute.xlu1 %1082 }
  0xe7   : > { %v1084_v18 = vrot.slane %v1083_v9, 6 }
  0xe9   : > { %605 = vrot.lane.b32.xlu1 %v599_v20, %s1685_s12  ;;  %v2052_v20 = vmul.bf16 %v1048_v13, %v1044_v10  ;;  %v1085_v15 = vsel %vm607_vm8, %v1084_v18, %v1083_v9 }
  0xea   : > { %640 = vrot.lane.b32.xlu0 %v638_v25, %s1682_s10  ;;  %v958_v25 = vcombine.low %v950_v49, %v950_v49  ;;  %v1087_v27 = vmul.bf16 %v1085_v15, %v1081_v23 }
  0xeb   : > { %v1052_v24 = vcombine.high %v2052_v20, %v2052_v20 }
  0xec   : > { %v1103_v17 = vrot.slane %v1087_v27, %v1835_v11  ;;  %v1089_v51 = vcombine.low %v1087_v27, %v1087_v27 }
  0xed   : > { %759 = vrot.lane.b32.xlu1 %v753_v28, %s1680_s6  ;;  %v2062_v28 = vrot.slane %v978_v46, %v1835_v11  ;;  %v1066_v32 = vrot.slane %v1052_v24, %v1835_v11  ;;  %v856_v46 = vrot.slane %v848_v7, %v1835_v11 }
  0xee   : > { %719 = vrot.lane.b32.xlu0 %v716_v33, %s1684_s13  ;;  %v1120_v33 = vpop.permute.xlu0 %1119  ;;  %v1105_v39 = vcombine.low %v1103_v17, %v1103_v17  ;;  %v1096_v26 = vrot.slane %v1089_v51, %v1835_v11 }
  0xef   : > { %v995_v36 = vcombine.high %v2062_v28, %v2062_v28  ;;  %v1068_v47 = vcombine.low %v1066_v32, %v1066_v32  ;;  %v857_v30 = vcombine.high %v856_v46, %v856_v46 }
  0xf1   : > { %890 = vrot.lane.b32.xlu1 %v884_v37, %s1676_s24  ;;  %v1121_v37 = vrot.slane %v1120_v33, 6  ;;  %861 = vst [vmem:[#allocation3 + $0x38] sm:$0x3] %v857_v30 }
  0xf2   : > { %835 = vrot.lane.b32.xlu0 %v2003_v40, %s1678_s30 }
  0xf3   : > { %v1122_v3 = vsel %vm569_vm0, %v1121_v37, %v1120_v33 }
  0xf4   : > { %v2087_v50 = vmul.bf16 %v1122_v3, %v1118_v44 }
  0xf5   : > { %373 = vrot.lane.b32.xlu1 %v367_v38, %s1690_s16  ;;  %v513_v38 = vcombine.low %v1966_v1, %v1966_v1  ;;  %v1194_v1 = vsel %vm472_vm12, %v1193_v43, %v1192_v16  ;;  %v1059_v16 = vrot.slane %v2052_v20, %v1835_v11  ;;  %s2316_s16 = smov 94  }
  0xf6   : > { %794 = vrot.lane.b32.xlu0 %v792_v45, %s1681_s8  ;;  %v1156_v45 = vpop.permute.xlu1 %1155  ;;  %v1133_v12 = vrot.slane %v2087_v50, %v1835_v11 }
  0xf7   : > { %v1157_v54 = vrot.slane %v1156_v45, 6 }
  0xf8   : > { %v1141_v3 = vcombine.high %v1133_v12, %v1133_v12 }
  0xf9   : > { %519 = vrot.lane.b32.xlu1 %v514_v52, %s1687_s11  ;;  %v1190_v52 = vld [vmem:[#allocation2 + $0x2] sm:$0x3f]  ;;  %v1158_v61 = vsel %vm521_vm3, %v1157_v54, %v1156_v45 }
  0xfa   : > { %962 = vrot.lane.b32.xlu0 %v950_v49, %s1674_s21  ;;  %v639_v49 = vcombine.low %v637_v41, %v637_v41  ;;  %v1229_v57 = vpop.permute.xlu1 %1228 }
  0xfd   : > { %417 = vrot.lane.b32.xlu1 %v408_v48, %s1689_s15  ;;  %v2093_v48 = vmul.bf16 %v1194_v1, %v1190_v52 }
  0xfe   : > { %886 = vrot.lane.b32.xlu0 %v877_v55, %s1676_s24  ;;  %v1126_v55 = vcombine.high %v2087_v50, %v2087_v50 }
 0x100   : > { %v1140_v0 = vrot.slane %v1126_v55, %v1835_v11 }
 0x101   : > { %567 = vrot.lane.b32.xlu1 %v561_v58, %s1688_s23  ;;  %v906_v58 = vcombine.high %v1934_v42, %v1934_v42 }
 0x102   : > { %1000 = vrot.lane.b32.xlu0 %v994_v56, %s1679_s5  ;;  %v1104_v56 = vcombine.low %v1096_v26, %v1096_v26 }
 0x103   : > { %v920_v42 = vrot.slane %v906_v58, %v1835_v11 }
 0x105   : > { %601 = vrot.lane.b32.xlu1 %v592_v60, %s1685_s12  ;;  %v1154_v60 = vld [vmem:[#allocation2 + $0x2] sm:$0x3f]  ;;  %v922_v10 = vcombine.low %v920_v42, %v920_v42 }
 0x106   : > { %419 = vrot.lane.b32.xlu0 %v416_v62, %s1689_s15  ;;  %v1230_v62 = vrot.slane %v1229_v57, 6  ;;  %s2315_s15 = smov 95  }
 0x108   : > { %v1231_v5 = vsel %vm423_vm11, %v1230_v62, %v1229_v57 }
 0x109   : > { %721 = vrot.lane.b32.xlu1 %v715_v63, %s1684_s13  ;;  %v1198_v63 = vcombine.high %v2093_v48, %v2093_v48  ;;  %s2314_s13 = smov 96  }
 0x10a   : > { %603 = vrot.lane.b32.xlu0 %v600_v2, %s1685_s12  ;;  %s2311_s12 = smov 110   ;;  %v831_v2 = vcombine.low %v2003_v40, %v2003_v40 }
 0x10b   : > { %v1212_v9 = vrot.slane %v1198_v63, %v1835_v11 }
 0x10d   : > { %837 = vrot.lane.b32.xlu1 %v832_v6, %s1678_s30  ;;  %v1266_v6 = vpop.permute.xlu1 %1265  ;;  %v1214_v18 = vcombine.low %v1212_v9, %v1212_v9 }
 0x10e   : > { %757 = vrot.lane.b32.xlu0 %v754_v8, %s1680_s6 }
 0x111   : > { %755 = vrot.lane.b32.xlu1 %v746_v4, %s1680_s6  ;;  %v1227_v4 = vld [vmem:[#allocation2 + $0x2] sm:$0x3f]  ;;  %s1488_s6 = sshll.u32 %s1741_s0, 8  ;;  %s1373_s0 = scalar_lea.sflag [#allocation7], %s1825_s7 }
 0x112   : > { %888 = vrot.lane.b32.xlu0 %v885_v21, %s1676_s24  ;;  %v1233_v7 = vmul.bf16 %v1231_v5, %v1227_v4 }
 0x114   : > { %v1249_v21 = vrot.slane %v1233_v7, %v1835_v11 }
 0x115   : > { %964 = vrot.lane.b32.xlu1 %v959_v22, %s1674_s21  ;;  %v1267_v22 = vrot.slane %v1266_v6, 6 }
 0x116   : > { %960 = vrot.lane.b32.xlu0 %v958_v25, %s1674_s21  ;;  %v1235_v25 = vcombine.low %v1233_v7, %v1233_v7 }
 0x117   : > { %v1268_v32 = vsel %vm375_vm14, %v1267_v22, %v1266_v6 }
 0x118   : > { %v1242_v37 = vrot.slane %v1235_v25, %v1835_v11 }
 0x119   : > { %923 = vrot.lane.b32.xlu1 %v921_v29, %s1677_s26  ;;  %v1251_v29 = vcombine.low %v1249_v21, %v1249_v21 }
 0x11a   : > { %1036 = vrot.lane.b32.xlu0 %v1030_v31, %s1668_s9  ;;  %v1264_v31 = vld [vmem:[#allocation2 + $0x2] sm:$0x3f]  ;;  %v1250_v41 = vcombine.low %v1242_v37, %v1242_v37 }
 0x11b   : > { %v1270_v35 = vmul.bf16 %v1268_v32, %v1264_v31 }
 0x11d   : > { %998 = vrot.lane.b32.xlu1 %v995_v36, %s1679_s5  ;;  %v1279_v54 = vrot.slane %v1270_v35, %v1835_v11 }
 0x11e   : > { %1073 = vrot.lane.b32.xlu0 %v1068_v47, %s2310_s27 }
 0x11f   : > { %v1287_v58 = vcombine.high %v1279_v54, %v1279_v54 }
 0x121   : > { %515 = vrot.lane.b32.xlu1 %v513_v38, %s1687_s11  ;;  %s2313_s11 = smov 97   ;;  %v1067_v38 = vcombine.low %v1059_v16, %v1059_v16 }
 0x122   : > { %1110 = vrot.lane.b32.xlu0 %v1105_v39, %s2311_s12  ;;  %v1272_v39 = vcombine.high %v1270_v35, %v1270_v35 }
 0x124   : > { %v1286_v44 = vrot.slane %v1272_v39, %v1835_v11 }
 0x125   : > { %644 = vrot.lane.b32.xlu1 %v639_v49, %s1682_s10  ;;  %v1205_v49 = vrot.slane %v2093_v48, %v1835_v11 }
 0x126   : > { %1032 = vrot.lane.b32.xlu0 %v1957_v59, %s1668_s9  ;;  %v1160_v59 = vmul.bf16 %v1158_v61, %v1154_v60  ;;  %s2312_s9 = smov 98  }
 0x127   : > { %v1213_v48 = vcombine.low %v1205_v49, %v1205_v49 }
 0x128   : > { %v1176_v8 = vrot.slane %v1160_v59, %v1835_v11  ;;  %v1162_v24 = vcombine.low %v1160_v59, %v1160_v59 }
 0x129   : > { %798 = vrot.lane.b32.xlu1 %v793_v19, %s1681_s8 }
 0x12a   : > { %1106 = vrot.lane.b32.xlu0 %v1104_v56, %s2311_s12  ;;  %v1169_v17 = vrot.slane %v1162_v24, %v1835_v11  ;;  %v1315_v11 = vld [vmem:[%s2278_s3] sm:$0xff] }
 0x12c   : > { %v469_v34 = vpop.permute.xlu0 %468 }
 0x12d   : > { %833 = vrot.lane.b32.xlu1 %v831_v2, %s1678_s30  ;;  %s1366_s30 = sld [smem:[#allocation4]] }
 0x12e   : > { %1146 = vrot.lane.b32.xlu0 %v1140_v0, %s2312_s9 }
 0x130   : > { %v467_v13 = vpop.permute.xlu0 %466 }
 0x131   : > { %v473_v40 = vsel %vm472_vm12, %v467_v13, %v469_v34  ;;  %927 = vrot.lane.b32.xlu1 %v922_v10, %s1677_s26 }
 0x132   : > { %477 = vst [vmem:[#allocation3] sm:$0x30] %v473_v40  ;;  %1182 = vrot.lane.b32.xlu0 %v1176_v8, %s2313_s11  ;;  %v684_v14 = vpop.permute.xlu1 %683 }
 0x134   : > { %v682_v23 = vpop.permute.xlu0 %681 }
 0x135   : > { %1071 = vrot.lane.b32.xlu1 %v1059_v16, %s2310_s27  ;;  %v687_v15 = vsel %vm685_vm1, %v682_v23, %v684_v14 }
 0x136   : > { %691 = vst [vmem:[#allocation3 + $0x18] sm:$0xc0] %v687_v15  ;;  %1219 = vrot.lane.b32.xlu0 %v1214_v18, %s2314_s13  ;;  %v471_v27 = vpop.permute.xlu1 %470 }
 0x137   : > { %v474_v33 = vsel %vm472_vm12, %v469_v34, %v471_v27 }
 0x138   : > { %v370_v20 = vpop.permute.xlu0 %369  ;;  %478 = vst [vmem:[#allocation3 + $0x8] sm:$0x30] %v474_v33 }
 0x139   : > { %1108 = vrot.lane.b32.xlu1 %v1096_v26, %s2311_s12  ;;  %s2231_s12 = scalar_lea.hbm %s2279_s4, %s1488_s6 }
 0x13a   : > { %1256 = vrot.lane.b32.xlu0 %v1251_v29, %s2315_s15  ;;  %v680_v36 = vpop.permute.xlu1 %679 }
 0x13b   : > { %v686_v47 = vsel %vm685_vm1, %v680_v36, %v682_v23 }
 0x13c   : > { %v2131_v51 = vpop.permute.xlu0 %642  ;;  %690 = vst [vmem:[#allocation3 + $0x10] sm:$0xc0] %v686_v47 }
 0x13d   : > { %996 = vrot.lane.b32.xlu1 %v2062_v28, %s1679_s5  ;;  %v1177_v28 = vcombine.high %v1169_v17, %v1169_v17  ;;  %s1465_s5 = sshll.u32 %s1825_s7, 4 }
 0x13e   : > { %1178 = vrot.lane.b32.xlu0 %v1169_v17, %s2313_s11  ;;  %s214_s8 = scalar_lea.vmem [#allocation8], %s1465_s5 }
 0x13f   : > { %s1387_s10 = sshll.u32 %s214_s8, 4  ;;  %s2233_s10 = int_to_ptr.vmem [resolvable:$true] %s1387_s10 }
 0x140   : > { %v564_v43 = vpop.permute.xlu0 %563 }
 0x141   : > { %1069 = vrot.lane.b32.xlu1 %v1067_v38, %s2310_s27 }
 0x142   : > { %1252 = vrot.lane.b32.xlu0 %v1250_v41, %s2315_s15 }
 0x144   : > { %v2141_v45 = vpop.permute.xlu0 %796 }
 0x145   : > { %1144 = vrot.lane.b32.xlu1 %v1141_v3, %s2312_s9 }
 0x146   : > { %1292 = vrot.lane.b32.xlu0 %v1286_v44, %s2316_s16 }
 0x148   : > { %v718_v46 = vpop.permute.xlu0 %717 }
 0x149   : > { %1180 = vrot.lane.b32.xlu1 %v1177_v28, %s2313_s11  ;;  %s1691_s11 = smov [#allocation8]  }
 0x14a   : > { %1318 = vperm.xlu0 %1563, %v1315_v11  }
 0x14c   : > { %v2148_v50 = vpop.permute.xlu0 %925 }
 0x14d   : > { %1217 = vrot.lane.b32.xlu1 %v1205_v49, %s2314_s13 }
 0x150   : > { %v372_v26 = vpop.permute.xlu0 %371 }
 0x151   : > { %v376_v52 = vsel %vm375_vm14, %v370_v20, %v372_v26  ;;  %1254 = vrot.lane.b32.xlu1 %v1242_v37, %s2315_s15 }
 0x152   : > { %380 = vst [vmem:[#allocation3] sm:$0x3] %v376_v52 }
 0x153   : > { %v2153_v1 = vpop.permute.xlu1 %1034 }
 0x154   : > { %v2155_v53 = vpop.permute.xlu0 %517 }
 0x155   : > { %1142 = vrot.lane.b32.xlu1 %v1133_v12, %s2312_s9  ;;  %s1594_s9 = scalar_lea.vmem %s2233_s10, 256 }
 0x156   : > { %p1595_p6 = scmp.ne.s32.totalorder %s2233_s10, %s1594_s9 }
 0x157   : > { %v422_v30 = vpop.permute.xlu1 %421 }
 0x158   : > { %v566_v55 = vpop.permute.xlu0 %565  ;;  %p1596_p12 = pnand %p1595_p6, %p2333_p11 }
 0x159   : > { %v570_v56 = vsel %vm569_vm0, %v564_v43, %v566_v55  ;;  %1215 = vrot.lane.b32.xlu1 %v1213_v48, %s2314_s13  ;;  %s1598_s13 = sshll.u32 %s1691_s11, 4  ;;  %s1599_s13 = int_to_ptr.vmem [resolvable:$false] %s1598_s13 }
 0x15a   : > { %574 = vst [vmem:[#allocation3 + $0x10] sm:$0x3] %v570_v56  ;;  %p1597_p13 = pneg %p1596_p12  ;;  %s1600_s15 = scalar_lea.vmem %s1599_s13, 512 }
 0x15b   : > { %v606_v57 = vpop.permute.xlu1 %605  ;;  %p1601_p7 = scmp.lt.s32.totalorder %s2233_s10, %s1599_s13  ;;  %p1602_p10 = scmp.lt.s32.totalorder %s1600_s15, %s1594_s9 }
 0x15c   : > { %v641_v19 = vpop.permute.xlu0 %640 }
 0x15d   : > { %v647_v60 = vsel %vm646_vm2, %v641_v19, %v2131_v51  ;;  %1290 = vrot.lane.b32.xlu1 %v1287_v58, %s2316_s16  ;;  %p1603_p2 = por %p1602_p10, %p1601_p7 }
 0x15e   : > { %651 = vst [vmem:[#allocation3 + $0x10] sm:$0x30] %v647_v60 }
 0x15f   : > { %v760_v61 = vpop.permute.xlu1 %759  ;;  %p1604_p4 = pnand %p1603_p2, %p1597_p13 }
 0x160   : > { %v720_v62 = vpop.permute.xlu0 %719 }
 0x161   : > { %v724_v63 = vsel %vm723_vm10, %v718_v46, %v720_v62  ;;  %1288 = vrot.lane.b32.xlu1 %v1279_v54, %s2316_s16 }
 0x162   : > { %728 = vst [vmem:[#allocation3 + $0x20] sm:$0x3] %v724_v63 }
 0x163   : > { %v891_v59 = vpop.permute.xlu1 %890 }
 0x164   : > { %v2169_v0 = vpop.permute.xlu0 %835 }
 0x167   : > { %v374_v2 = vpop.permute.xlu1 %373 }
 0x168   : > { %v377_v42 = vsel %vm375_vm14, %v372_v26, %v374_v2  ;;  %v795_v4 = vpop.permute.xlu0 %794 }
 0x169   : > { %381 = vst [vmem:[#allocation3 + $0x8] sm:$0x3] %v377_v42  ;;  %v801_v5 = vsel %vm800_vm15, %v795_v4, %v2141_v45 }
 0x16a   : > { %805 = vst [vmem:[#allocation3 + $0x20] sm:$0x30] %v801_v5 }
 0x16b   : > { %v520_v34 = vpop.permute.xlu1 %519 }
 0x16c   : > { %v523_v6 = vsel %vm521_vm3, %v2155_v53, %v520_v34  ;;  %v963_v7 = vpop.permute.xlu0 %962 }
 0x16d   : > { %527 = vst [vmem:[#allocation3 + $0x8] sm:$0xc0] %v523_v6 }
 0x16f   : > { %v418_v8 = vpop.permute.xlu1 %417 }
 0x170   : > { %v887_v9 = vpop.permute.xlu0 %886 }
 0x173   : > { %v568_v10 = vpop.permute.xlu1 %567 }
 0x174   : > { %v571_v13 = vsel %vm569_vm0, %v566_v55, %v568_v10  ;;  %v1001_v40 = vpop.permute.xlu0 %1000  ;;  %vm2324_vm0 = vcmask 793600  }
 0x175   : > { %575 = vst [vmem:[#allocation3 + $0x18] sm:$0x3] %v571_v13  ;;  %vm2325_vm1 = vmmov %vm2324_vm0 }
 0x177   : > { %v602_v14 = vpop.permute.xlu1 %601 }
 0x178   : > { %v420_v18 = vpop.permute.xlu0 %419 }
 0x179   : > { %v424_v21 = vsel %vm423_vm11, %v418_v8, %v420_v18  ;;  %v425_v16 = vsel %vm423_vm11, %v420_v18, %v422_v30  ;;  %vm2319_vm11 = vcmask 900096  }
 0x17a   : > { %428 = vst [vmem:[#allocation3] sm:$0xc] %v424_v21  ;;  %429 = vst [vmem:[#allocation3 + $0x8] sm:$0xc] %v425_v16 }
 0x17b   : > { %v722_v22 = vpop.permute.xlu1 %721  ;;  %vm2320_vm12 = vmmov %vm2319_vm11 }
 0x17c   : > { %v725_v23 = vsel %vm723_vm10, %v720_v62, %v722_v22  ;;  %v604_v15 = vpop.permute.xlu0 %603  ;;  %vm2318_vm10 = vcmask 908288  }
 0x17d   : > { %729 = vst [vmem:[#allocation3 + $0x28] sm:$0x3] %v725_v23  ;;  %v608_v24 = vsel %vm607_vm8, %v602_v14, %v604_v15  ;;  %v609_v25 = vsel %vm607_vm8, %v604_v15, %v606_v57  ;;  %vm2317_vm8 = vcmask 924672   ;;  %vm2322_vm14 = vmmov %vm2318_vm10 }
 0x17e   : > { %612 = vst [vmem:[#allocation3 + $0x10] sm:$0xc] %v608_v24  ;;  %613 = vst [vmem:[#allocation3 + $0x18] sm:$0xc] %v609_v25 }
 0x17f   : > { %v838_v27 = vpop.permute.xlu1 %837 }
 0x180   : > { %v841_v29 = vsel %vm839_vm6, %v2169_v0, %v838_v27  ;;  %v758_v31 = vpop.permute.xlu0 %757 }
 0x181   : > { %845 = vst [vmem:[#allocation3 + $0x28] sm:$0xc0] %v841_v29  ;;  %v763_v32 = vsel %vm761_vm7, %v758_v31, %v760_v61  ;;  %v1302_v33 = vld [vmem:[#allocation3 + $0x8] sm:$0xff] }
 0x182   : > { %767 = vst [vmem:[#allocation3 + $0x28] sm:$0xc] %v763_v32  ;;  %1325 = vmatprep.subr.bf16.mxu0 %v1302_v33 }
 0x183   : > { %v756_v20 = vpop.permute.xlu1 %755 }
 0x184   : > { %v762_v35 = vsel %vm761_vm7, %v756_v20, %v758_v31  ;;  %v889_v17 = vpop.permute.xlu0 %888  ;;  %vm2331_vm7 = vcmask 769024  }
 0x185   : > { %766 = vst [vmem:[#allocation3 + $0x20] sm:$0xc] %v762_v35  ;;  %v892_v36 = vsel %vm811_vm5, %v887_v9, %v889_v17  ;;  %v893_v37 = vsel %vm811_vm5, %v889_v17, %v891_v59 }
 0x186   : > { %896 = vst [vmem:[#allocation3 + $0x30] sm:$0xc] %v892_v36  ;;  %897 = vst [vmem:[#allocation3 + $0x38] sm:$0xc] %v893_v37 }
 0x187   : > { %v965_v47 = vpop.permute.xlu1 %964 }
 0x188   : > { %v967_v39 = vsel %vm734_vm4, %v963_v7, %v965_v47  ;;  %v961_v41 = vpop.permute.xlu0 %960 }
 0x189   : > { %971 = vst [vmem:[#allocation3 + $0x38] sm:$0xc0] %v967_v39  ;;  %v966_v12 = vsel %vm734_vm4, %v961_v41, %v963_v7 }
 0x18a   : > { %970 = vst [vmem:[#allocation3 + $0x30] sm:$0xc0] %v966_v12 }
 0x18b   : > { %v924_v38 = vpop.permute.xlu1 %923 }
 0x18c   : > { %v929_v43 = vsel %vm772_vm13, %v924_v38, %v2148_v50  ;;  %v1037_v44 = vpop.permute.xlu0 %1036 }
 0x18d   : > { %933 = vst [vmem:[#allocation3 + $0x30] sm:$0x30] %v929_v43  ;;  %v1039_v3 = vsel %vm657_vm9, %v2153_v1, %v1037_v44 }
 0x18e   : > { %1043 = vst [vmem:[#allocation3 + $0x48] sm:$0xc] %v1039_v3 }
 0x18f   : > { %v999_v28 = vpop.permute.xlu1 %998 }
 0x190   : > { %v1003_v46 = vsel %vm2317_vm8, %v999_v28, %v1001_v40  ;;  %v1074_v49 = vpop.permute.xlu0 %1073 }
 0x191   : > { %1007 = vst [vmem:[#allocation3 + $0x48] sm:$0x3] %v1003_v46 }
 0x193   : > { %v516_v26 = vpop.permute.xlu1 %515 }
 0x194   : > { %v522_v52 = vsel %vm521_vm3, %v516_v26, %v2155_v53  ;;  %v1111_v54 = vpop.permute.xlu0 %1110  ;;  %vm2327_vm3 = vcmask 777216   ;;  %v1367_v26 = vstv %s1366_s30 }
 0x195   : > { %526 = vst [vmem:[#allocation3] sm:$0xc0] %v522_v52  ;;  %vm2328_vm4 = vmmov %vm2327_vm3 }
 0x197   : > { %v645_v30 = vpop.permute.xlu1 %644 }
 0x198   : > { %v648_v48 = vsel %vm646_vm2, %v2131_v51, %v645_v30  ;;  %v1033_v55 = vpop.permute.xlu0 %1032  ;;  %v1303_v51 = vld [vmem:[#allocation3 + $0x10] sm:$0xff]  ;;  %vm2326_vm2 = vcmask 785408  }
 0x199   : > { %652 = vst [vmem:[#allocation3 + $0x18] sm:$0x30] %v648_v48  ;;  %v1038_v56 = vsel %vm657_vm9, %v1033_v55, %v2153_v1 }
 0x19a   : > { %1042 = vst [vmem:[#allocation3 + $0x40] sm:$0xc] %v1038_v56 }
 0x19b   : > { %v799_v57 = vpop.permute.xlu1 %798 }
 0x19c   : > { %v802_v58 = vsel %vm800_vm15, %v2141_v45, %v799_v57  ;;  %v1301_v19 = vld [vmem:[#allocation3] sm:$0xff]  ;;  %v1107_v53 = vpop.permute.xlu0 %1106  ;;  %vm2323_vm15 = vcmask 801792  }
 0x19d   : > { %806 = vst [vmem:[#allocation3 + $0x28] sm:$0x30] %v802_v58  ;;  %1326 = vmatpush1.bf16.msra.mxu0 %v1301_v19  ;;  %vm2329_vm5 = vmmov %vm2323_vm15 }
 0x19f   : > { %v834_v60 = vpop.permute.xlu1 %833 }
 0x1a0   : > { %v840_v61 = vsel %vm839_vm6, %v834_v60, %v2169_v0  ;;  %v1304_v62 = vld [vmem:[#allocation3 + $0x18] sm:$0xff]  ;;  %v1147_v1 = vpop.permute.xlu0 %1146  ;;  %vm2330_vm6 = vmmov %vm2326_vm2 }
 0x1a1   : > { %844 = vst [vmem:[#allocation3 + $0x20] sm:$0xc0] %v840_v61  ;;  %1327 = vmatprep.subr.bf16.mxu0 %v1304_v62 }
 0x1a2   : > { %1328 = vmatpush1.bf16.msra.mxu0 %v1303_v51 }
 0x1a3   : > { %v928_v11 = vpop.permute.xlu1 %927 }
 0x1a4   : > { %v930_v63 = vsel %vm772_vm13, %v2148_v50, %v928_v11  ;;  %v1306_v59 = vld [vmem:[#allocation3 + $0x28] sm:$0xff]  ;;  %v1183_v4 = vpop.permute.xlu0 %1182  ;;  %v1307_v50 = vld [vmem:[#allocation3 + $0x30] sm:$0xff]  ;;  %vm2321_vm13 = vmmov %vm2317_vm8 }
 0x1a5   : > { %934 = vst [vmem:[#allocation3 + $0x38] sm:$0x30] %v930_v63  ;;  %1329 = vmatprep.subr.bf16.mxu0 %v1306_v59  ;;  %vm2332_vm8 = vmmov %vm2331_vm7 }
 0x1a7   : > { %v1072_v45 = vpop.permute.xlu1 %1071 }
 0x1a8   : > { %v1076_v2 = vsel %vm2318_vm10, %v1072_v45, %v1074_v49  ;;  %v1305_v42 = vld [vmem:[#allocation3 + $0x20] sm:$0xff]  ;;  %v1220_v7 = vpop.permute.xlu0 %1219 }
 0x1a9   : > { %1080 = vst [vmem:[#allocation3 + $0x48] sm:$0x30] %v1076_v2  ;;  %1330 = vmatpush1.bf16.msra.mxu0 %v1305_v42 }
 0x1ab   : > { %v1109_v0 = vpop.permute.xlu1 %1108 }
 0x1ac   : > { %v1112_v5 = vsel %vm2319_vm11, %v1107_v53, %v1109_v0  ;;  %v1113_v34 = vsel %vm2320_vm12, %v1109_v0, %v1111_v54  ;;  %v1308_v6 = vld [vmem:[#allocation3 + $0x38] sm:$0xff]  ;;  %v1257_v14 = vpop.permute.xlu0 %1256 }
 0x1ad   : > { %1116 = vst [vmem:[#allocation3 + $0x40] sm:$0xc0] %v1112_v5  ;;  %1117 = vst [vmem:[#allocation3 + $0x48] sm:$0xc0] %v1113_v34  ;;  %1331 = vmatprep.subr.bf16.mxu0 %v1308_v6 }
 0x1ae   : > { %1332 = vmatpush1.bf16.msra.mxu0 %v1307_v50 }
 0x1af   : > { %v997_v8 = vpop.permute.xlu1 %996 }
 0x1b0   : > { %v1002_v9 = vsel %vm2321_vm13, %v997_v8, %v999_v28  ;;  %v1179_v16 = vpop.permute.xlu0 %1178  ;;  %v1300_v28 = vld [vmem:[%s2277_s2] sm:$0xf] }
 0x1b1   : > { %1006 = vst [vmem:[#allocation3 + $0x40] sm:$0x3] %v1002_v9 }
 0x1b3   : > { %v1070_v10 = vpop.permute.xlu1 %1069 }
 0x1b4   : > { %v1075_v13 = vsel %vm2322_vm14, %v1070_v10, %v1072_v45  ;;  %v1310_v40 = vld [vmem:[#allocation3 + $0x48] sm:$0xff]  ;;  %v1253_v29 = vpop.permute.xlu0 %1252 }
 0x1b5   : > { %1079 = vst [vmem:[#allocation3 + $0x40] sm:$0x30] %v1075_v13  ;;  %1333 = vmatprep.subr.bf16.mxu0 %v1310_v40 }
 0x1b7   : > { %v1145_v18 = vpop.permute.xlu1 %1144 }
 0x1b8   : > { %v1149_v21 = vsel %vm2323_vm15, %v1145_v18, %v1147_v1  ;;  %v1293_v47 = vpop.permute.xlu0 %1292 }
 0x1b9   : > { %1153 = vst [vmem:[#allocation3 + $0x58] sm:$0x3] %v1149_v21 }
 0x1bb   : > { %v1181_v22 = vpop.permute.xlu1 %1180 }
 0x1bc   : > { %v1184_v23 = vsel %vm2324_vm0, %v1179_v16, %v1181_v22  ;;  %v1185_v15 = vsel %vm2325_vm1, %v1181_v22, %v1183_v4  ;;  %v1309_v24 = vld [vmem:[#allocation3 + $0x40] sm:$0xff] }
 0x1bd   : > { %1188 = vst [vmem:[#allocation3 + $0x50] sm:$0xc] %v1184_v23  ;;  %1189 = vst [vmem:[#allocation3 + $0x58] sm:$0xc] %v1185_v15  ;;  %1334 = vmatpush1.bf16.msra.mxu0 %v1309_v24 }
 0x1bf   : > { %v1218_v25 = vpop.permute.xlu1 %1217 }
 0x1c0   : > { %v1222_v27 = vsel %vm2326_vm2, %v1218_v25, %v1220_v7 }
 0x1c1   : > { %1226 = vst [vmem:[#allocation3 + $0x58] sm:$0x30] %v1222_v27 }
 0x1c3   : > { %v1255_v31 = vpop.permute.xlu1 %1254 }
 0x1c4   : > { %v1258_v32 = vsel %vm2327_vm3, %v1253_v29, %v1255_v31  ;;  %v1259_v33 = vsel %vm2328_vm4, %v1255_v31, %v1257_v14 }
 0x1c5   : > { %1262 = vst [vmem:[#allocation3 + $0x50] sm:$0xc0] %v1258_v32  ;;  %1263 = vst [vmem:[#allocation3 + $0x58] sm:$0xc0] %v1259_v33 }
 0x1c7   : > { %v1143_v20 = vpop.permute.xlu1 %1142 }
 0x1c8   : > { %v1148_v35 = vsel %vm2329_vm5, %v1143_v20, %v1145_v18 }
 0x1c9   : > { %1152 = vst [vmem:[#allocation3 + $0x50] sm:$0x3] %v1148_v35  ;;  %v1319_v46 = vpop.permute.xlu0 %1318 }
 0x1cb   : > { %v1216_v17 = vpop.permute.xlu1 %1215 }
 0x1cc   : > { %v1221_v36 = vsel %vm2330_vm6, %v1216_v17, %v1218_v25  ;;  %v1312_v37 = vld [vmem:[#allocation3 + $0x58] sm:$0xff] }
 0x1cd   : > { %1225 = vst [vmem:[#allocation3 + $0x50] sm:$0x30] %v1221_v36  ;;  %1335 = vmatprep.subr.bf16.mxu0 %v1312_v37 }
 0x1cf   : > { %v1291_v39 = vpop.permute.xlu1 %1290 }
 0x1d0   : > { %v1295_v41 = vsel %vm2331_vm7, %v1291_v39, %v1293_v47 }
 0x1d1   : > { %1299 = vst [vmem:[#allocation3 + $0x68] sm:$0x3] %v1295_v41 }
 0x1d3   : > { %v1289_v12 = vpop.permute.xlu1 %1288 }
 0x1d4   : > { %v1294_v38 = vsel %vm2332_vm8, %v1289_v12, %v1291_v39  ;;  %v1311_v43 = vld [vmem:[#allocation3 + $0x50] sm:$0xff] }
 0x1d5   : > { %1298 = vst [vmem:[#allocation3 + $0x60] sm:$0x3] %v1294_v38  ;;  %1336 = vmatpush1.bf16.msra.mxu0 %v1311_v43 }
 0x1d8   : > { %v1314_v44 = vld [vmem:[#allocation3 + $0x68] sm:$0xff] }
 0x1d9   : > { %1337 = vmatprep.subr.bf16.mxu0 %v1314_v44 }
 0x1dc   : > { %v1313_v3 = vld [vmem:[#allocation3 + $0x60] sm:$0xff] }
 0x1dd   : > { %1338 = vmatpush1.bf16.msra.mxu0 %v1313_v3 }
 0x1e0   : > { %1481 = vmatmul.mubr.msk.bf16.vlgmr.msra.gmra.mrb[0].mxu0 %vm657_vm9, %v1300_v28 }
 0x2b3   : > { %v1359_v49 = vpop.f32.mrb[0].mxu0 }
 0x2b4   : > { %v1360_v52 = vadd.f32 %v1359_v49, %v1319_v46  ;;  %v1361_v54 = vpop.f32.mrb[1].mxu0 }
 0x2b5   : > { %v1362_v30 = vadd.f32 %v1361_v54, %v1319_v46  ;;  %v1363_v48 = vpop.f32.mrb[2].mxu0 }
 0x2b6   : > { %v1368_v55 = vmul.f32 %v1367_v26, %v1360_v52  ;;  %v1364_v56 = vpop.f32.mrb[3].mxu0 }
 0x2b7   : > { %v1369_v57 = vmul.f32 %v1367_v26, %v1362_v30 }
 0x2b8   : > { %1370 = vst [vmem:[%s214_s8] sm:$0xff] %v1368_v55 }
 0x2b9   : > { %1371 = vst [vmem:[%s214_s8 + $0x8] sm:$0xff] %v1369_v57 }
 0x2ba   : > { %1607 = shalt.err (!%p1604_p4)
}
 0x2bb   : > { %s1608_s7 = scalar_lea.hbm %s2231_s12, 256  ;;  %s1612_s23 = scalar_lea.hbm %s2279_s4, 512 }
 0x2bc   : > { %p1609_p5 = scmp.ne.s32.totalorder %s2231_s12, %s1608_s7  ;;  %p1613_p0 = scmp.lt.u32.totalorder %s2231_s12, %s2279_s4 }
 0x2bd   : > { %p1614_p1 = scmp.lt.u32.totalorder %s1612_s23, %s1608_s7  ;;  %p1616_p6 = scmp.lt.u32.totalorder %s1608_s7, %s2231_s12 }
 0x2be   : > { %p1610_p8 = pnand %p1609_p5, %p2333_p11 }
 0x2bf   : > { %p1615_p3 = por %p1614_p1, %p1613_p0 }
 0x2c0   : > { %p1611_p9 = pneg %p1610_p8 }
 0x2c1   : > { %p1617_p12 = por %p1616_p6, %p1615_p3 }
 0x2c3   : > { %p1618_p13 = pnand %p1617_p12, %p1611_p9 }
 0x2c5   : > { %1621 = shalt.err (!%p1618_p13)
}
 0x2c6   : > { %1491 = dma.vmem_to_hbm [thread:$0]  (%p2333_p11), %s2233_s10, 256, %s2231_s12, %s1373_s0  }
 0x2c7 PF: > { %s1399_s30 = sand.u32 1, %s1648_s17   ;;  %p2334_p7 = scmp.ne.s32.totalorder %s2306_s29, 0 }
 0x2c8   : > { %p2335_p10 = scmp.ge.s32.totalorder %s1660_s20, 2  ;;  %s1400_s5 = scalar_lea.sflag [#allocation7], %s1399_s30 }
 0x2ca   : > { %p1498_p2 = pnand %p2335_p10, %p2334_p7 }
 0x2cc   : > { %1643 = dma.done.wait (!%p1498_p2), %s1400_s5, 256  }
 0x2cd   : > { %1645 = vsyncadd (!%p1498_p2), %s1400_s5, 4294967040  ;;  %p18_p4 = scmp.ge.s32.totalorder %s1745_s22, 4   ;;  %s2336_s17 = smov %s1652_s18 }
 0x2ce   : > { %s2337_s18 = smov %s1656_s19  ;;  %s2338_s19 = smov %s1757_s25 }
 0x2cf   : > { %s2339_s20 = smov %s1745_s22  ;;  %20 = sbr.rel (!%p18_p4) target bundleno = 7 (0x7), region = 81 }
 0x2d6   :  { %1405 = vsyncpa [#allocation6], 1 }
 0x2d7   :  { %1407 = vsyncpa [#allocation6 + $0x1], 1 }
 0x2d8   :  { %1408 = vsyncpa [#allocation7], 1 }
 0x2d9   :  { %1410 = vsyncpa [#allocation7 + $0x1], 1 }

</bundles_post_ra>
